<compile_context>
chip_gen: v7x
topology: tpu7x:2x2x1
jax: 0.10.0
libtpu: 0.0.40
codegen_flags: <defaults>
</compile_context>

<pallas_src>
import math

import jax
import jax.numpy as jnp
from jax.experimental import pallas as pl
from jax.experimental.pallas import tpu as pltpu


# ----------------------------------------------------------------------------
# Fused kernel: stacked GRU (num_layers) + Linear + Sigmoid.
# Sequence rows are t-major (row = t*B + b); output is (T*B, H), reordered to
# batch-first (B, T, H) by the wrapper (trivial layout plumbing).
# ----------------------------------------------------------------------------
def _make_generator_kernel(num_layers, B, T, H, GP):
    def kernel(*refs):
        z_ref = refs[0]
        layer_refs = refs[1:1 + 4 * num_layers]
        fc_w_ref = refs[1 + 4 * num_layers]
        fc_b_ref = refs[2 + 4 * num_layers]
        out_ref = refs[3 + 4 * num_layers]

        # t-major flattened sequence of the current layer's inputs: (T*B, In).
        x_seq = z_ref[...]

        for l in range(num_layers):
            w_i_ref, w_h_ref, b_i_ref, b_hn_ref = layer_refs[4 * l:4 * l + 4]

            # (1) Batched input projection over ALL timesteps (off the
            # recurrent critical path).  Gates live at 128-lane-aligned
            # offsets 0 / GP / 2*GP, so the per-gate slices are free.
            gi = jnp.dot(x_seq, w_i_ref[...],
                         preferred_element_type=jnp.float32) + b_i_ref[...]
            gi_r = gi[:, 0:H]                       # (T*B, H)
            gi_z = gi[:, GP:GP + H]
            gi_n = gi[:, 2 * GP:2 * GP + H]

            # Only this layer's recurrent weights are live across the t-loop.
            w_h = w_h_ref[...]                      # (H, 3*GP)
            b_hn = b_hn_ref[...]                    # (1, H)

            # (2) Recurrence: one fused h @ W_h dot per step.
            h = jnp.zeros((B, H), jnp.float32)
            hs = []
            for t in range(T):
                o = t * B
                gh = jnp.dot(h, w_h, preferred_element_type=jnp.float32)
                r = jax.nn.sigmoid(gi_r[o:o + B] + gh[:, 0:H])
                zg = jax.nn.sigmoid(gi_z[o:o + B] + gh[:, GP:GP + H])
                n = jnp.tanh(gi_n[o:o + B]
                             + r * (gh[:, 2 * GP:2 * GP + H] + b_hn))
                h = n + zg * (h - n)                # == (1 - zg)*n + zg*h
                hs.append(h)

            # t-major hidden sequence -> next layer's input.
            x_seq = jnp.concatenate(hs, axis=0)     # (T*B, H)

        # (3) fc + sigmoid head batched over all T*B rows; single full-block
        # output store (no per-timestep partial stores).
        y = jnp.dot(x_seq, fc_w_ref[...],
                    preferred_element_type=jnp.float32) + fc_b_ref[...]
        out_ref[...] = jax.nn.sigmoid(y)

    return kernel


# ----------------------------------------------------------------------------
# Wrapper: one pallas_call, all operands resident in VMEM (<1 MiB total).
# ----------------------------------------------------------------------------
@jax.jit
def generator_forward(params, Z):
    """Z: (B, T, z_dim), batch-first like the PyTorch module. Returns (B, T, H)."""
    B, T, Zd = Z.shape
    H = params["fc_w"].shape[0]
    GP = params["layers"][0]["w_h"].shape[1] // 3
    num_layers = len(params["layers"])

    # t-major flatten of Z (row = t*B + b): tiny XLA transpose outside the kernel.
    z_tb = jnp.transpose(Z.astype(jnp.float32), (1, 0, 2)).reshape(T * B, Zd)

    inputs = [z_tb]
    in_specs = [pl.BlockSpec((T * B, Zd), lambda i: (0, 0))]
    for lp in params["layers"]:
        for name in ("w_i", "w_h", "b_i", "b_hn"):
            a = lp[name]
            inputs.append(a)
            in_specs.append(pl.BlockSpec(a.shape, lambda i: (0, 0)))
    inputs += [params["fc_w"], params["fc_b"]]
    in_specs += [pl.BlockSpec(params["fc_w"].shape, lambda i: (0, 0)),
                 pl.BlockSpec(params["fc_b"].shape, lambda i: (0, 0))]

    kernel = _make_generator_kernel(num_layers, B, T, H, GP)
    y_tb = pl.pallas_call(
        kernel,
        out_shape=jax.ShapeDtypeStruct((T * B, H), jnp.float32),
        grid=(1,),
        in_specs=in_specs,
        out_specs=pl.BlockSpec((T * B, H), lambda i: (0, 0)),
        compiler_params=pltpu.CompilerParams(
            dimension_semantics=("arbitrary",)),
    )(*inputs)

    # Back to batch-first (B, T, H): trivial layout plumbing outside the kernel.
    return jnp.transpose(y_tb.reshape(T, B, H), (1, 0, 2))


# ----------------------------------------------------------------------------
# Parameter init matching the PyTorch module (xavier_uniform weights,
# bias_ih = 1, bias_hh = 0, fc bias = 0), repacked gate-fused with a 128-lane
# gate pitch and pre-transposed for x @ W.
# ----------------------------------------------------------------------------
def xavier_uniform(key, shape):
    fan_out, fan_in = shape
    bound = math.sqrt(6.0 / (fan_in + fan_out))
    return jax.random.uniform(key, shape, jnp.float32, -bound, bound)


def init_generator_params(key, z_dim, hidden_dim, num_layers):
    H = hidden_dim
    GP = ((H + 127) // 128) * 128        # 128-lane (vreg-aligned) gate pitch
    layers = []
    for l in range(num_layers):
        in_dim = z_dim if l == 0 else H
        key, k1, k2 = jax.random.split(key, 3)
        w_ih = xavier_uniform(k1, (3 * H, in_dim))   # PyTorch (3H, In), rows [r|z|n]
        w_hh = xavier_uniform(k2, (3 * H, H))        # PyTorch (3H, H)
        b_ih = jnp.ones((3 * H,), jnp.float32)       # .fill_(1)
        b_hh = jnp.zeros((3 * H,), jnp.float32)      # .fill_(0)

        w_i = jnp.zeros((in_dim, 3 * GP), jnp.float32)
        w_h = jnp.zeros((H, 3 * GP), jnp.float32)
        b_i = jnp.zeros((1, 3 * GP), jnp.float32)
        for g in range(3):
            w_i = w_i.at[:, g * GP:g * GP + H].set(w_ih[g * H:(g + 1) * H, :].T)
            w_h = w_h.at[:, g * GP:g * GP + H].set(w_hh[g * H:(g + 1) * H, :].T)
        # Input-path bias row: r,z gates get b_ih + b_hh (both are purely
        # additive there); n gate gets only b_ih (b_hh_n stays inside r*(...)).
        b_i = b_i.at[0, 0 * GP:0 * GP + H].set(b_ih[0:H] + b_hh[0:H])
        b_i = b_i.at[0, 1 * GP:1 * GP + H].set(b_ih[H:2 * H] + b_hh[H:2 * H])
        b_i = b_i.at[0, 2 * GP:2 * GP + H].set(b_ih[2 * H:3 * H])
        b_hn = b_hh[2 * H:3 * H].reshape(1, H)

        layers.append(dict(w_i=w_i, w_h=w_h, b_i=b_i, b_hn=b_hn))

    key, kf = jax.random.split(key)
    w_fc = xavier_uniform(kf, (H, H))                # PyTorch Linear (out, in)
    return dict(layers=layers,
                fc_w=w_fc.T,                         # (H, H) for x @ W.T
                fc_b=jnp.zeros((1, H), jnp.float32))


# ----------------------------------------------------------------------------
# Pure-JAX reference (lax.scan) for correctness check.
# ----------------------------------------------------------------------------
def generator_reference(params, Z):
    B, T, _ = Z.shape
    H = params["fc_w"].shape[0]
    GP = params["layers"][0]["w_h"].shape[1] // 3
    hp = jax.lax.Precision.HIGHEST
    x = jnp.transpose(Z, (1, 0, 2)).astype(jnp.float32)   # (T, B, In)
    for lp in params["layers"]:
        w_i, w_h, b_i, b_hn = lp["w_i"], lp["w_h"], lp["b_i"], lp["b_hn"]
        h0 = jnp.zeros((B, H), jnp.float32)

        def step(h, xt, w_i=w_i, w_h=w_h, b_i=b_i, b_hn=b_hn):
            gi = jnp.dot(xt, w_i, precision=hp) + b_i
            gh = jnp.dot(h, w_h, precision=hp)
            r = jax.nn.sigmoid(gi[:, 0:H] + gh[:, 0:H])
            z = jax.nn.sigmoid(gi[:, GP:GP + H] + gh[:, GP:GP + H])
            n = jnp.tanh(gi[:, 2 * GP:2 * GP + H]
                         + r * (gh[:, 2 * GP:2 * GP + H] + b_hn))
            h_new = (1.0 - z) * n + z * h
            return h_new, h_new

        _, x = jax.lax.scan(step, h0, x)
    y = jax.nn.sigmoid(jnp.dot(x, params["fc_w"], precision=hp) + params["fc_b"])
    return jnp.transpose(y, (1, 0, 2))                     # (B, T, H)


if __name__ == "__main__":
    # Small config consistent with the TimeGAN Generator.
    param = dict(num_layers=2, hidden_dim=32, Z_dim=4, input_dim=4,
                 module="gru", device=None)
    B, T = 2, 8

    key = jax.random.PRNGKey(0)
    kz, kp = jax.random.split(key)
    Z = jax.random.normal(kz, (B, T, param["Z_dim"]), jnp.float32)
    params = init_generator_params(kp, param["Z_dim"], param["hidden_dim"],
                                   param["num_layers"])

    out = jax.block_until_ready(generator_forward(params, Z))
    assert out.shape == (B, T, param["hidden_dim"]), out.shape

    ref = generator_reference(params, Z)
    err = float(jnp.max(jnp.abs(out - ref)))
    assert err < 1e-5, f"max err {err}"

    print("KERNEL_OK")
</pallas_src>

<mosaic_0001>
module attributes {stable_mosaic.version = 11 : i64} {
  func.func @kernel(%arg0: i32, %arg1: memref<16x4xf32, #tpu.memory_space<vmem>>, %arg2: memref<4x384xf32, #tpu.memory_space<vmem>>, %arg3: memref<32x384xf32, #tpu.memory_space<vmem>>, %arg4: memref<1x384xf32, #tpu.memory_space<vmem>>, %arg5: memref<1x32xf32, #tpu.memory_space<vmem>>, %arg6: memref<32x384xf32, #tpu.memory_space<vmem>>, %arg7: memref<32x384xf32, #tpu.memory_space<vmem>>, %arg8: memref<1x384xf32, #tpu.memory_space<vmem>>, %arg9: memref<1x32xf32, #tpu.memory_space<vmem>>, %arg10: memref<32x32xf32, #tpu.memory_space<vmem>>, %arg11: memref<1x32xf32, #tpu.memory_space<vmem>>, %arg12: memref<16x32xf32, #tpu.memory_space<vmem>>) attributes {dimension_semantics = [#tpu.dimension_semantics<arbitrary>], iteration_bounds = array<i64: 1>, scalar_prefetch = 0 : i64, scratch_operands = 0 : i64, tpu.core_type = #tpu.core_type<tc>, window_params = [{pipeline_mode = #tpu.pipeline_mode<synchronous>, transform_indices = @transform_0, window_bounds = array<i64: 16, 4>}, {pipeline_mode = #tpu.pipeline_mode<synchronous>, transform_indices = @transform_1, window_bounds = array<i64: 4, 384>}, {pipeline_mode = #tpu.pipeline_mode<synchronous>, transform_indices = @transform_2, window_bounds = array<i64: 32, 384>}, {pipeline_mode = #tpu.pipeline_mode<synchronous>, transform_indices = @transform_3, window_bounds = array<i64: 1, 384>}, {pipeline_mode = #tpu.pipeline_mode<synchronous>, transform_indices = @transform_4, window_bounds = array<i64: 1, 32>}, {pipeline_mode = #tpu.pipeline_mode<synchronous>, transform_indices = @transform_5, window_bounds = array<i64: 32, 384>}, {pipeline_mode = #tpu.pipeline_mode<synchronous>, transform_indices = @transform_6, window_bounds = array<i64: 32, 384>}, {pipeline_mode = #tpu.pipeline_mode<synchronous>, transform_indices = @transform_7, window_bounds = array<i64: 1, 384>}, {pipeline_mode = #tpu.pipeline_mode<synchronous>, transform_indices = @transform_8, window_bounds = array<i64: 1, 32>}, {pipeline_mode = #tpu.pipeline_mode<synchronous>, transform_indices = @transform_9, window_bounds = array<i64: 32, 32>}, {pipeline_mode = #tpu.pipeline_mode<synchronous>, transform_indices = @transform_10, window_bounds = array<i64: 1, 32>}, {pipeline_mode = #tpu.pipeline_mode<synchronous>, transform_indices = @transform_11, window_bounds = array<i64: 16, 32>}]} {
    %c0 = arith.constant 0 : index
    %c0_0 = arith.constant 0 : index
    %0 = vector.load %arg1[%c0, %c0_0] : memref<16x4xf32, #tpu.memory_space<vmem>>, vector<16x4xf32>
    %c0_1 = arith.constant 0 : index
    %c0_2 = arith.constant 0 : index
    %1 = vector.load %arg2[%c0_1, %c0_2] : memref<4x384xf32, #tpu.memory_space<vmem>>, vector<4x384xf32>
    %cst = arith.constant dense<0.000000e+00> : vector<16x384xf32>
    %2 = tpu.matmul %0, %1, %cst {dimension_numbers = #tpu.dot_dimension_numbers<[1], [0], [0], [1], [0, 0, 1, 1], [], []>} : vector<16x4xf32>, vector<4x384xf32>, vector<16x384xf32> -> vector<16x384xf32>
    %c0_3 = arith.constant 0 : index
    %c0_4 = arith.constant 0 : index
    %3 = vector.load %arg4[%c0_3, %c0_4] : memref<1x384xf32, #tpu.memory_space<vmem>>, vector<1x384xf32>
    %4 = vector.broadcast %3 : vector<1x384xf32> to vector<16x384xf32>
    %5 = arith.addf %2, %4 : vector<16x384xf32>
    %6 = vector.extract_strided_slice %5 {offsets = [0, 0], sizes = [16, 32], strides = [1, 1]} : vector<16x384xf32> to vector<16x32xf32>
    %7 = vector.extract_strided_slice %5 {offsets = [0, 128], sizes = [16, 32], strides = [1, 1]} : vector<16x384xf32> to vector<16x32xf32>
    %8 = vector.extract_strided_slice %5 {offsets = [0, 256], sizes = [16, 32], strides = [1, 1]} : vector<16x384xf32> to vector<16x32xf32>
    %c0_5 = arith.constant 0 : index
    %c0_6 = arith.constant 0 : index
    %9 = vector.load %arg3[%c0_5, %c0_6] : memref<32x384xf32, #tpu.memory_space<vmem>>, vector<32x384xf32>
    %c0_7 = arith.constant 0 : index
    %c0_8 = arith.constant 0 : index
    %10 = vector.load %arg5[%c0_7, %c0_8] : memref<1x32xf32, #tpu.memory_space<vmem>>, vector<1x32xf32>
    %cst_9 = arith.constant 0.000000e+00 : f32
    %11 = vector.broadcast %cst_9 : f32 to vector<2x32xf32>
    %cst_10 = arith.constant dense<0.000000e+00> : vector<2x384xf32>
    %12 = tpu.matmul %11, %9, %cst_10 {dimension_numbers = #tpu.dot_dimension_numbers<[1], [0], [0], [1], [0, 0, 1, 1], [], []>} : vector<2x32xf32>, vector<32x384xf32>, vector<2x384xf32> -> vector<2x384xf32>
    %13 = vector.extract_strided_slice %6 {offsets = [0, 0], sizes = [2, 32], strides = [1, 1]} : vector<16x32xf32> to vector<2x32xf32>
    %14 = vector.extract_strided_slice %12 {offsets = [0, 0], sizes = [2, 32], strides = [1, 1]} : vector<2x384xf32> to vector<2x32xf32>
    %15 = arith.addf %13, %14 : vector<2x32xf32>
    %16 = arith.negf %15 : vector<2x32xf32>
    %17 = math.exp %16 : vector<2x32xf32>
    %cst_11 = arith.constant 1.000000e+00 : f32
    %18 = vector.broadcast %cst_11 : f32 to vector<2x32xf32>
    %19 = arith.addf %18, %17 : vector<2x32xf32>
    %20 = arith.divf %18, %19 : vector<2x32xf32>
    %21 = vector.extract_strided_slice %7 {offsets = [0, 0], sizes = [2, 32], strides = [1, 1]} : vector<16x32xf32> to vector<2x32xf32>
    %22 = vector.extract_strided_slice %12 {offsets = [0, 128], sizes = [2, 32], strides = [1, 1]} : vector<2x384xf32> to vector<2x32xf32>
    %23 = arith.addf %21, %22 : vector<2x32xf32>
    %24 = arith.negf %23 : vector<2x32xf32>
    %25 = math.exp %24 : vector<2x32xf32>
    %cst_12 = arith.constant 1.000000e+00 : f32
    %26 = vector.broadcast %cst_12 : f32 to vector<2x32xf32>
    %27 = arith.addf %26, %25 : vector<2x32xf32>
    %28 = arith.divf %26, %27 : vector<2x32xf32>
    %29 = vector.extract_strided_slice %8 {offsets = [0, 0], sizes = [2, 32], strides = [1, 1]} : vector<16x32xf32> to vector<2x32xf32>
    %30 = vector.extract_strided_slice %12 {offsets = [0, 256], sizes = [2, 32], strides = [1, 1]} : vector<2x384xf32> to vector<2x32xf32>
    %31 = vector.broadcast %10 : vector<1x32xf32> to vector<2x32xf32>
    %32 = arith.addf %30, %31 : vector<2x32xf32>
    %33 = arith.mulf %20, %32 : vector<2x32xf32>
    %34 = arith.addf %29, %33 : vector<2x32xf32>
    %35 = math.tanh %34 : vector<2x32xf32>
    %36 = arith.subf %11, %35 : vector<2x32xf32>
    %37 = arith.mulf %28, %36 : vector<2x32xf32>
    %38 = arith.addf %35, %37 : vector<2x32xf32>
    %cst_13 = arith.constant dense<0.000000e+00> : vector<2x384xf32>
    %39 = tpu.matmul %38, %9, %cst_13 {dimension_numbers = #tpu.dot_dimension_numbers<[1], [0], [0], [1], [0, 0, 1, 1], [], []>} : vector<2x32xf32>, vector<32x384xf32>, vector<2x384xf32> -> vector<2x384xf32>
    %40 = vector.extract_strided_slice %6 {offsets = [2, 0], sizes = [2, 32], strides = [1, 1]} : vector<16x32xf32> to vector<2x32xf32>
    %41 = vector.extract_strided_slice %39 {offsets = [0, 0], sizes = [2, 32], strides = [1, 1]} : vector<2x384xf32> to vector<2x32xf32>
    %42 = arith.addf %40, %41 : vector<2x32xf32>
    %43 = arith.negf %42 : vector<2x32xf32>
    %44 = math.exp %43 : vector<2x32xf32>
    %cst_14 = arith.constant 1.000000e+00 : f32
    %45 = vector.broadcast %cst_14 : f32 to vector<2x32xf32>
    %46 = arith.addf %45, %44 : vector<2x32xf32>
    %47 = arith.divf %45, %46 : vector<2x32xf32>
    %48 = vector.extract_strided_slice %7 {offsets = [2, 0], sizes = [2, 32], strides = [1, 1]} : vector<16x32xf32> to vector<2x32xf32>
    %49 = vector.extract_strided_slice %39 {offsets = [0, 128], sizes = [2, 32], strides = [1, 1]} : vector<2x384xf32> to vector<2x32xf32>
    %50 = arith.addf %48, %49 : vector<2x32xf32>
    %51 = arith.negf %50 : vector<2x32xf32>
    %52 = math.exp %51 : vector<2x32xf32>
    %cst_15 = arith.constant 1.000000e+00 : f32
    %53 = vector.broadcast %cst_15 : f32 to vector<2x32xf32>
    %54 = arith.addf %53, %52 : vector<2x32xf32>
    %55 = arith.divf %53, %54 : vector<2x32xf32>
    %56 = vector.extract_strided_slice %8 {offsets = [2, 0], sizes = [2, 32], strides = [1, 1]} : vector<16x32xf32> to vector<2x32xf32>
    %57 = vector.extract_strided_slice %39 {offsets = [0, 256], sizes = [2, 32], strides = [1, 1]} : vector<2x384xf32> to vector<2x32xf32>
    %58 = vector.broadcast %10 : vector<1x32xf32> to vector<2x32xf32>
    %59 = arith.addf %57, %58 : vector<2x32xf32>
    %60 = arith.mulf %47, %59 : vector<2x32xf32>
    %61 = arith.addf %56, %60 : vector<2x32xf32>
    %62 = math.tanh %61 : vector<2x32xf32>
    %63 = arith.subf %38, %62 : vector<2x32xf32>
    %64 = arith.mulf %55, %63 : vector<2x32xf32>
    %65 = arith.addf %62, %64 : vector<2x32xf32>
    %cst_16 = arith.constant dense<0.000000e+00> : vector<2x384xf32>
    %66 = tpu.matmul %65, %9, %cst_16 {dimension_numbers = #tpu.dot_dimension_numbers<[1], [0], [0], [1], [0, 0, 1, 1], [], []>} : vector<2x32xf32>, vector<32x384xf32>, vector<2x384xf32> -> vector<2x384xf32>
    %67 = vector.extract_strided_slice %6 {offsets = [4, 0], sizes = [2, 32], strides = [1, 1]} : vector<16x32xf32> to vector<2x32xf32>
    %68 = vector.extract_strided_slice %66 {offsets = [0, 0], sizes = [2, 32], strides = [1, 1]} : vector<2x384xf32> to vector<2x32xf32>
    %69 = arith.addf %67, %68 : vector<2x32xf32>
    %70 = arith.negf %69 : vector<2x32xf32>
    %71 = math.exp %70 : vector<2x32xf32>
    %cst_17 = arith.constant 1.000000e+00 : f32
    %72 = vector.broadcast %cst_17 : f32 to vector<2x32xf32>
    %73 = arith.addf %72, %71 : vector<2x32xf32>
    %74 = arith.divf %72, %73 : vector<2x32xf32>
    %75 = vector.extract_strided_slice %7 {offsets = [4, 0], sizes = [2, 32], strides = [1, 1]} : vector<16x32xf32> to vector<2x32xf32>
    %76 = vector.extract_strided_slice %66 {offsets = [0, 128], sizes = [2, 32], strides = [1, 1]} : vector<2x384xf32> to vector<2x32xf32>
    %77 = arith.addf %75, %76 : vector<2x32xf32>
    %78 = arith.negf %77 : vector<2x32xf32>
    %79 = math.exp %78 : vector<2x32xf32>
    %cst_18 = arith.constant 1.000000e+00 : f32
    %80 = vector.broadcast %cst_18 : f32 to vector<2x32xf32>
    %81 = arith.addf %80, %79 : vector<2x32xf32>
    %82 = arith.divf %80, %81 : vector<2x32xf32>
    %83 = vector.extract_strided_slice %8 {offsets = [4, 0], sizes = [2, 32], strides = [1, 1]} : vector<16x32xf32> to vector<2x32xf32>
    %84 = vector.extract_strided_slice %66 {offsets = [0, 256], sizes = [2, 32], strides = [1, 1]} : vector<2x384xf32> to vector<2x32xf32>
    %85 = vector.broadcast %10 : vector<1x32xf32> to vector<2x32xf32>
    %86 = arith.addf %84, %85 : vector<2x32xf32>
    %87 = arith.mulf %74, %86 : vector<2x32xf32>
    %88 = arith.addf %83, %87 : vector<2x32xf32>
    %89 = math.tanh %88 : vector<2x32xf32>
    %90 = arith.subf %65, %89 : vector<2x32xf32>
    %91 = arith.mulf %82, %90 : vector<2x32xf32>
    %92 = arith.addf %89, %91 : vector<2x32xf32>
    %cst_19 = arith.constant dense<0.000000e+00> : vector<2x384xf32>
    %93 = tpu.matmul %92, %9, %cst_19 {dimension_numbers = #tpu.dot_dimension_numbers<[1], [0], [0], [1], [0, 0, 1, 1], [], []>} : vector<2x32xf32>, vector<32x384xf32>, vector<2x384xf32> -> vector<2x384xf32>
    %94 = vector.extract_strided_slice %6 {offsets = [6, 0], sizes = [2, 32], strides = [1, 1]} : vector<16x32xf32> to vector<2x32xf32>
    %95 = vector.extract_strided_slice %93 {offsets = [0, 0], sizes = [2, 32], strides = [1, 1]} : vector<2x384xf32> to vector<2x32xf32>
    %96 = arith.addf %94, %95 : vector<2x32xf32>
    %97 = arith.negf %96 : vector<2x32xf32>
    %98 = math.exp %97 : vector<2x32xf32>
    %cst_20 = arith.constant 1.000000e+00 : f32
    %99 = vector.broadcast %cst_20 : f32 to vector<2x32xf32>
    %100 = arith.addf %99, %98 : vector<2x32xf32>
    %101 = arith.divf %99, %100 : vector<2x32xf32>
    %102 = vector.extract_strided_slice %7 {offsets = [6, 0], sizes = [2, 32], strides = [1, 1]} : vector<16x32xf32> to vector<2x32xf32>
    %103 = vector.extract_strided_slice %93 {offsets = [0, 128], sizes = [2, 32], strides = [1, 1]} : vector<2x384xf32> to vector<2x32xf32>
    %104 = arith.addf %102, %103 : vector<2x32xf32>
    %105 = arith.negf %104 : vector<2x32xf32>
    %106 = math.exp %105 : vector<2x32xf32>
    %cst_21 = arith.constant 1.000000e+00 : f32
    %107 = vector.broadcast %cst_21 : f32 to vector<2x32xf32>
    %108 = arith.addf %107, %106 : vector<2x32xf32>
    %109 = arith.divf %107, %108 : vector<2x32xf32>
    %110 = vector.extract_strided_slice %8 {offsets = [6, 0], sizes = [2, 32], strides = [1, 1]} : vector<16x32xf32> to vector<2x32xf32>
    %111 = vector.extract_strided_slice %93 {offsets = [0, 256], sizes = [2, 32], strides = [1, 1]} : vector<2x384xf32> to vector<2x32xf32>
    %112 = vector.broadcast %10 : vector<1x32xf32> to vector<2x32xf32>
    %113 = arith.addf %111, %112 : vector<2x32xf32>
    %114 = arith.mulf %101, %113 : vector<2x32xf32>
    %115 = arith.addf %110, %114 : vector<2x32xf32>
    %116 = math.tanh %115 : vector<2x32xf32>
    %117 = arith.subf %92, %116 : vector<2x32xf32>
    %118 = arith.mulf %109, %117 : vector<2x32xf32>
    %119 = arith.addf %116, %118 : vector<2x32xf32>
    %cst_22 = arith.constant dense<0.000000e+00> : vector<2x384xf32>
    %120 = tpu.matmul %119, %9, %cst_22 {dimension_numbers = #tpu.dot_dimension_numbers<[1], [0], [0], [1], [0, 0, 1, 1], [], []>} : vector<2x32xf32>, vector<32x384xf32>, vector<2x384xf32> -> vector<2x384xf32>
    %121 = vector.extract_strided_slice %6 {offsets = [8, 0], sizes = [2, 32], strides = [1, 1]} : vector<16x32xf32> to vector<2x32xf32>
    %122 = vector.extract_strided_slice %120 {offsets = [0, 0], sizes = [2, 32], strides = [1, 1]} : vector<2x384xf32> to vector<2x32xf32>
    %123 = arith.addf %121, %122 : vector<2x32xf32>
    %124 = arith.negf %123 : vector<2x32xf32>
    %125 = math.exp %124 : vector<2x32xf32>
    %cst_23 = arith.constant 1.000000e+00 : f32
    %126 = vector.broadcast %cst_23 : f32 to vector<2x32xf32>
    %127 = arith.addf %126, %125 : vector<2x32xf32>
    %128 = arith.divf %126, %127 : vector<2x32xf32>
    %129 = vector.extract_strided_slice %7 {offsets = [8, 0], sizes = [2, 32], strides = [1, 1]} : vector<16x32xf32> to vector<2x32xf32>
    %130 = vector.extract_strided_slice %120 {offsets = [0, 128], sizes = [2, 32], strides = [1, 1]} : vector<2x384xf32> to vector<2x32xf32>
    %131 = arith.addf %129, %130 : vector<2x32xf32>
    %132 = arith.negf %131 : vector<2x32xf32>
    %133 = math.exp %132 : vector<2x32xf32>
    %cst_24 = arith.constant 1.000000e+00 : f32
    %134 = vector.broadcast %cst_24 : f32 to vector<2x32xf32>
    %135 = arith.addf %134, %133 : vector<2x32xf32>
    %136 = arith.divf %134, %135 : vector<2x32xf32>
    %137 = vector.extract_strided_slice %8 {offsets = [8, 0], sizes = [2, 32], strides = [1, 1]} : vector<16x32xf32> to vector<2x32xf32>
    %138 = vector.extract_strided_slice %120 {offsets = [0, 256], sizes = [2, 32], strides = [1, 1]} : vector<2x384xf32> to vector<2x32xf32>
    %139 = vector.broadcast %10 : vector<1x32xf32> to vector<2x32xf32>
    %140 = arith.addf %138, %139 : vector<2x32xf32>
    %141 = arith.mulf %128, %140 : vector<2x32xf32>
    %142 = arith.addf %137, %141 : vector<2x32xf32>
    %143 = math.tanh %142 : vector<2x32xf32>
    %144 = arith.subf %119, %143 : vector<2x32xf32>
    %145 = arith.mulf %136, %144 : vector<2x32xf32>
    %146 = arith.addf %143, %145 : vector<2x32xf32>
    %cst_25 = arith.constant dense<0.000000e+00> : vector<2x384xf32>
    %147 = tpu.matmul %146, %9, %cst_25 {dimension_numbers = #tpu.dot_dimension_numbers<[1], [0], [0], [1], [0, 0, 1, 1], [], []>} : vector<2x32xf32>, vector<32x384xf32>, vector<2x384xf32> -> vector<2x384xf32>
    %148 = vector.extract_strided_slice %6 {offsets = [10, 0], sizes = [2, 32], strides = [1, 1]} : vector<16x32xf32> to vector<2x32xf32>
    %149 = vector.extract_strided_slice %147 {offsets = [0, 0], sizes = [2, 32], strides = [1, 1]} : vector<2x384xf32> to vector<2x32xf32>
    %150 = arith.addf %148, %149 : vector<2x32xf32>
    %151 = arith.negf %150 : vector<2x32xf32>
    %152 = math.exp %151 : vector<2x32xf32>
    %cst_26 = arith.constant 1.000000e+00 : f32
    %153 = vector.broadcast %cst_26 : f32 to vector<2x32xf32>
    %154 = arith.addf %153, %152 : vector<2x32xf32>
    %155 = arith.divf %153, %154 : vector<2x32xf32>
    %156 = vector.extract_strided_slice %7 {offsets = [10, 0], sizes = [2, 32], strides = [1, 1]} : vector<16x32xf32> to vector<2x32xf32>
    %157 = vector.extract_strided_slice %147 {offsets = [0, 128], sizes = [2, 32], strides = [1, 1]} : vector<2x384xf32> to vector<2x32xf32>
    %158 = arith.addf %156, %157 : vector<2x32xf32>
    %159 = arith.negf %158 : vector<2x32xf32>
    %160 = math.exp %159 : vector<2x32xf32>
    %cst_27 = arith.constant 1.000000e+00 : f32
    %161 = vector.broadcast %cst_27 : f32 to vector<2x32xf32>
    %162 = arith.addf %161, %160 : vector<2x32xf32>
    %163 = arith.divf %161, %162 : vector<2x32xf32>
    %164 = vector.extract_strided_slice %8 {offsets = [10, 0], sizes = [2, 32], strides = [1, 1]} : vector<16x32xf32> to vector<2x32xf32>
    %165 = vector.extract_strided_slice %147 {offsets = [0, 256], sizes = [2, 32], strides = [1, 1]} : vector<2x384xf32> to vector<2x32xf32>
    %166 = vector.broadcast %10 : vector<1x32xf32> to vector<2x32xf32>
    %167 = arith.addf %165, %166 : vector<2x32xf32>
    %168 = arith.mulf %155, %167 : vector<2x32xf32>
    %169 = arith.addf %164, %168 : vector<2x32xf32>
    %170 = math.tanh %169 : vector<2x32xf32>
    %171 = arith.subf %146, %170 : vector<2x32xf32>
    %172 = arith.mulf %163, %171 : vector<2x32xf32>
    %173 = arith.addf %170, %172 : vector<2x32xf32>
    %cst_28 = arith.constant dense<0.000000e+00> : vector<2x384xf32>
    %174 = tpu.matmul %173, %9, %cst_28 {dimension_numbers = #tpu.dot_dimension_numbers<[1], [0], [0], [1], [0, 0, 1, 1], [], []>} : vector<2x32xf32>, vector<32x384xf32>, vector<2x384xf32> -> vector<2x384xf32>
    %175 = vector.extract_strided_slice %6 {offsets = [12, 0], sizes = [2, 32], strides = [1, 1]} : vector<16x32xf32> to vector<2x32xf32>
    %176 = vector.extract_strided_slice %174 {offsets = [0, 0], sizes = [2, 32], strides = [1, 1]} : vector<2x384xf32> to vector<2x32xf32>
    %177 = arith.addf %175, %176 : vector<2x32xf32>
    %178 = arith.negf %177 : vector<2x32xf32>
    %179 = math.exp %178 : vector<2x32xf32>
    %cst_29 = arith.constant 1.000000e+00 : f32
    %180 = vector.broadcast %cst_29 : f32 to vector<2x32xf32>
    %181 = arith.addf %180, %179 : vector<2x32xf32>
    %182 = arith.divf %180, %181 : vector<2x32xf32>
    %183 = vector.extract_strided_slice %7 {offsets = [12, 0], sizes = [2, 32], strides = [1, 1]} : vector<16x32xf32> to vector<2x32xf32>
    %184 = vector.extract_strided_slice %174 {offsets = [0, 128], sizes = [2, 32], strides = [1, 1]} : vector<2x384xf32> to vector<2x32xf32>
    %185 = arith.addf %183, %184 : vector<2x32xf32>
    %186 = arith.negf %185 : vector<2x32xf32>
    %187 = math.exp %186 : vector<2x32xf32>
    %cst_30 = arith.constant 1.000000e+00 : f32
    %188 = vector.broadcast %cst_30 : f32 to vector<2x32xf32>
    %189 = arith.addf %188, %187 : vector<2x32xf32>
    %190 = arith.divf %188, %189 : vector<2x32xf32>
    %191 = vector.extract_strided_slice %8 {offsets = [12, 0], sizes = [2, 32], strides = [1, 1]} : vector<16x32xf32> to vector<2x32xf32>
    %192 = vector.extract_strided_slice %174 {offsets = [0, 256], sizes = [2, 32], strides = [1, 1]} : vector<2x384xf32> to vector<2x32xf32>
    %193 = vector.broadcast %10 : vector<1x32xf32> to vector<2x32xf32>
    %194 = arith.addf %192, %193 : vector<2x32xf32>
    %195 = arith.mulf %182, %194 : vector<2x32xf32>
    %196 = arith.addf %191, %195 : vector<2x32xf32>
    %197 = math.tanh %196 : vector<2x32xf32>
    %198 = arith.subf %173, %197 : vector<2x32xf32>
    %199 = arith.mulf %190, %198 : vector<2x32xf32>
    %200 = arith.addf %197, %199 : vector<2x32xf32>
    %cst_31 = arith.constant dense<0.000000e+00> : vector<2x384xf32>
    %201 = tpu.matmul %200, %9, %cst_31 {dimension_numbers = #tpu.dot_dimension_numbers<[1], [0], [0], [1], [0, 0, 1, 1], [], []>} : vector<2x32xf32>, vector<32x384xf32>, vector<2x384xf32> -> vector<2x384xf32>
    %202 = vector.extract_strided_slice %6 {offsets = [14, 0], sizes = [2, 32], strides = [1, 1]} : vector<16x32xf32> to vector<2x32xf32>
    %203 = vector.extract_strided_slice %201 {offsets = [0, 0], sizes = [2, 32], strides = [1, 1]} : vector<2x384xf32> to vector<2x32xf32>
    %204 = arith.addf %202, %203 : vector<2x32xf32>
    %205 = arith.negf %204 : vector<2x32xf32>
    %206 = math.exp %205 : vector<2x32xf32>
    %cst_32 = arith.constant 1.000000e+00 : f32
    %207 = vector.broadcast %cst_32 : f32 to vector<2x32xf32>
    %208 = arith.addf %207, %206 : vector<2x32xf32>
    %209 = arith.divf %207, %208 : vector<2x32xf32>
    %210 = vector.extract_strided_slice %7 {offsets = [14, 0], sizes = [2, 32], strides = [1, 1]} : vector<16x32xf32> to vector<2x32xf32>
    %211 = vector.extract_strided_slice %201 {offsets = [0, 128], sizes = [2, 32], strides = [1, 1]} : vector<2x384xf32> to vector<2x32xf32>
    %212 = arith.addf %210, %211 : vector<2x32xf32>
    %213 = arith.negf %212 : vector<2x32xf32>
    %214 = math.exp %213 : vector<2x32xf32>
    %cst_33 = arith.constant 1.000000e+00 : f32
    %215 = vector.broadcast %cst_33 : f32 to vector<2x32xf32>
    %216 = arith.addf %215, %214 : vector<2x32xf32>
    %217 = arith.divf %215, %216 : vector<2x32xf32>
    %218 = vector.extract_strided_slice %8 {offsets = [14, 0], sizes = [2, 32], strides = [1, 1]} : vector<16x32xf32> to vector<2x32xf32>
    %219 = vector.extract_strided_slice %201 {offsets = [0, 256], sizes = [2, 32], strides = [1, 1]} : vector<2x384xf32> to vector<2x32xf32>
    %220 = vector.broadcast %10 : vector<1x32xf32> to vector<2x32xf32>
    %221 = arith.addf %219, %220 : vector<2x32xf32>
    %222 = arith.mulf %209, %221 : vector<2x32xf32>
    %223 = arith.addf %218, %222 : vector<2x32xf32>
    %224 = math.tanh %223 : vector<2x32xf32>
    %225 = arith.subf %200, %224 : vector<2x32xf32>
    %226 = arith.mulf %217, %225 : vector<2x32xf32>
    %227 = arith.addf %224, %226 : vector<2x32xf32>
    %228 = tpu.concatenate %38, %65, %92, %119, %146, %173, %200, %227 in 0 : vector<2x32xf32>, vector<2x32xf32>, vector<2x32xf32>, vector<2x32xf32>, vector<2x32xf32>, vector<2x32xf32>, vector<2x32xf32>, vector<2x32xf32> -> vector<16x32xf32>
    %c0_34 = arith.constant 0 : index
    %c0_35 = arith.constant 0 : index
    %229 = vector.load %arg6[%c0_34, %c0_35] : memref<32x384xf32, #tpu.memory_space<vmem>>, vector<32x384xf32>
    %cst_36 = arith.constant dense<0.000000e+00> : vector<16x384xf32>
    %230 = tpu.matmul %228, %229, %cst_36 {dimension_numbers = #tpu.dot_dimension_numbers<[1], [0], [0], [1], [0, 0, 1, 1], [], []>} : vector<16x32xf32>, vector<32x384xf32>, vector<16x384xf32> -> vector<16x384xf32>
    %c0_37 = arith.constant 0 : index
    %c0_38 = arith.constant 0 : index
    %231 = vector.load %arg8[%c0_37, %c0_38] : memref<1x384xf32, #tpu.memory_space<vmem>>, vector<1x384xf32>
    %232 = vector.broadcast %231 : vector<1x384xf32> to vector<16x384xf32>
    %233 = arith.addf %230, %232 : vector<16x384xf32>
    %234 = vector.extract_strided_slice %233 {offsets = [0, 0], sizes = [16, 32], strides = [1, 1]} : vector<16x384xf32> to vector<16x32xf32>
    %235 = vector.extract_strided_slice %233 {offsets = [0, 128], sizes = [16, 32], strides = [1, 1]} : vector<16x384xf32> to vector<16x32xf32>
    %236 = vector.extract_strided_slice %233 {offsets = [0, 256], sizes = [16, 32], strides = [1, 1]} : vector<16x384xf32> to vector<16x32xf32>
    %c0_39 = arith.constant 0 : index
    %c0_40 = arith.constant 0 : index
    %237 = vector.load %arg7[%c0_39, %c0_40] : memref<32x384xf32, #tpu.memory_space<vmem>>, vector<32x384xf32>
    %c0_41 = arith.constant 0 : index
    %c0_42 = arith.constant 0 : index
    %238 = vector.load %arg9[%c0_41, %c0_42] : memref<1x32xf32, #tpu.memory_space<vmem>>, vector<1x32xf32>
    %cst_43 = arith.constant 0.000000e+00 : f32
    %239 = vector.broadcast %cst_43 : f32 to vector<2x32xf32>
    %cst_44 = arith.constant dense<0.000000e+00> : vector<2x384xf32>
    %240 = tpu.matmul %239, %237, %cst_44 {dimension_numbers = #tpu.dot_dimension_numbers<[1], [0], [0], [1], [0, 0, 1, 1], [], []>} : vector<2x32xf32>, vector<32x384xf32>, vector<2x384xf32> -> vector<2x384xf32>
    %241 = vector.extract_strided_slice %234 {offsets = [0, 0], sizes = [2, 32], strides = [1, 1]} : vector<16x32xf32> to vector<2x32xf32>
    %242 = vector.extract_strided_slice %240 {offsets = [0, 0], sizes = [2, 32], strides = [1, 1]} : vector<2x384xf32> to vector<2x32xf32>
    %243 = arith.addf %241, %242 : vector<2x32xf32>
    %244 = arith.negf %243 : vector<2x32xf32>
    %245 = math.exp %244 : vector<2x32xf32>
    %cst_45 = arith.constant 1.000000e+00 : f32
    %246 = vector.broadcast %cst_45 : f32 to vector<2x32xf32>
    %247 = arith.addf %246, %245 : vector<2x32xf32>
    %248 = arith.divf %246, %247 : vector<2x32xf32>
    %249 = vector.extract_strided_slice %235 {offsets = [0, 0], sizes = [2, 32], strides = [1, 1]} : vector<16x32xf32> to vector<2x32xf32>
    %250 = vector.extract_strided_slice %240 {offsets = [0, 128], sizes = [2, 32], strides = [1, 1]} : vector<2x384xf32> to vector<2x32xf32>
    %251 = arith.addf %249, %250 : vector<2x32xf32>
    %252 = arith.negf %251 : vector<2x32xf32>
    %253 = math.exp %252 : vector<2x32xf32>
    %cst_46 = arith.constant 1.000000e+00 : f32
    %254 = vector.broadcast %cst_46 : f32 to vector<2x32xf32>
    %255 = arith.addf %254, %253 : vector<2x32xf32>
    %256 = arith.divf %254, %255 : vector<2x32xf32>
    %257 = vector.extract_strided_slice %236 {offsets = [0, 0], sizes = [2, 32], strides = [1, 1]} : vector<16x32xf32> to vector<2x32xf32>
    %258 = vector.extract_strided_slice %240 {offsets = [0, 256], sizes = [2, 32], strides = [1, 1]} : vector<2x384xf32> to vector<2x32xf32>
    %259 = vector.broadcast %238 : vector<1x32xf32> to vector<2x32xf32>
    %260 = arith.addf %258, %259 : vector<2x32xf32>
    %261 = arith.mulf %248, %260 : vector<2x32xf32>
    %262 = arith.addf %257, %261 : vector<2x32xf32>
    %263 = math.tanh %262 : vector<2x32xf32>
    %264 = arith.subf %239, %263 : vector<2x32xf32>
    %265 = arith.mulf %256, %264 : vector<2x32xf32>
    %266 = arith.addf %263, %265 : vector<2x32xf32>
    %cst_47 = arith.constant dense<0.000000e+00> : vector<2x384xf32>
    %267 = tpu.matmul %266, %237, %cst_47 {dimension_numbers = #tpu.dot_dimension_numbers<[1], [0], [0], [1], [0, 0, 1, 1], [], []>} : vector<2x32xf32>, vector<32x384xf32>, vector<2x384xf32> -> vector<2x384xf32>
    %268 = vector.extract_strided_slice %234 {offsets = [2, 0], sizes = [2, 32], strides = [1, 1]} : vector<16x32xf32> to vector<2x32xf32>
    %269 = vector.extract_strided_slice %267 {offsets = [0, 0], sizes = [2, 32], strides = [1, 1]} : vector<2x384xf32> to vector<2x32xf32>
    %270 = arith.addf %268, %269 : vector<2x32xf32>
    %271 = arith.negf %270 : vector<2x32xf32>
    %272 = math.exp %271 : vector<2x32xf32>
    %cst_48 = arith.constant 1.000000e+00 : f32
    %273 = vector.broadcast %cst_48 : f32 to vector<2x32xf32>
    %274 = arith.addf %273, %272 : vector<2x32xf32>
    %275 = arith.divf %273, %274 : vector<2x32xf32>
    %276 = vector.extract_strided_slice %235 {offsets = [2, 0], sizes = [2, 32], strides = [1, 1]} : vector<16x32xf32> to vector<2x32xf32>
    %277 = vector.extract_strided_slice %267 {offsets = [0, 128], sizes = [2, 32], strides = [1, 1]} : vector<2x384xf32> to vector<2x32xf32>
    %278 = arith.addf %276, %277 : vector<2x32xf32>
    %279 = arith.negf %278 : vector<2x32xf32>
    %280 = math.exp %279 : vector<2x32xf32>
    %cst_49 = arith.constant 1.000000e+00 : f32
    %281 = vector.broadcast %cst_49 : f32 to vector<2x32xf32>
    %282 = arith.addf %281, %280 : vector<2x32xf32>
    %283 = arith.divf %281, %282 : vector<2x32xf32>
    %284 = vector.extract_strided_slice %236 {offsets = [2, 0], sizes = [2, 32], strides = [1, 1]} : vector<16x32xf32> to vector<2x32xf32>
    %285 = vector.extract_strided_slice %267 {offsets = [0, 256], sizes = [2, 32], strides = [1, 1]} : vector<2x384xf32> to vector<2x32xf32>
    %286 = vector.broadcast %238 : vector<1x32xf32> to vector<2x32xf32>
    %287 = arith.addf %285, %286 : vector<2x32xf32>
    %288 = arith.mulf %275, %287 : vector<2x32xf32>
    %289 = arith.addf %284, %288 : vector<2x32xf32>
    %290 = math.tanh %289 : vector<2x32xf32>
    %291 = arith.subf %266, %290 : vector<2x32xf32>
    %292 = arith.mulf %283, %291 : vector<2x32xf32>
    %293 = arith.addf %290, %292 : vector<2x32xf32>
    %cst_50 = arith.constant dense<0.000000e+00> : vector<2x384xf32>
    %294 = tpu.matmul %293, %237, %cst_50 {dimension_numbers = #tpu.dot_dimension_numbers<[1], [0], [0], [1], [0, 0, 1, 1], [], []>} : vector<2x32xf32>, vector<32x384xf32>, vector<2x384xf32> -> vector<2x384xf32>
    %295 = vector.extract_strided_slice %234 {offsets = [4, 0], sizes = [2, 32], strides = [1, 1]} : vector<16x32xf32> to vector<2x32xf32>
    %296 = vector.extract_strided_slice %294 {offsets = [0, 0], sizes = [2, 32], strides = [1, 1]} : vector<2x384xf32> to vector<2x32xf32>
    %297 = arith.addf %295, %296 : vector<2x32xf32>
    %298 = arith.negf %297 : vector<2x32xf32>
    %299 = math.exp %298 : vector<2x32xf32>
    %cst_51 = arith.constant 1.000000e+00 : f32
    %300 = vector.broadcast %cst_51 : f32 to vector<2x32xf32>
    %301 = arith.addf %300, %299 : vector<2x32xf32>
    %302 = arith.divf %300, %301 : vector<2x32xf32>
    %303 = vector.extract_strided_slice %235 {offsets = [4, 0], sizes = [2, 32], strides = [1, 1]} : vector<16x32xf32> to vector<2x32xf32>
    %304 = vector.extract_strided_slice %294 {offsets = [0, 128], sizes = [2, 32], strides = [1, 1]} : vector<2x384xf32> to vector<2x32xf32>
    %305 = arith.addf %303, %304 : vector<2x32xf32>
    %306 = arith.negf %305 : vector<2x32xf32>
    %307 = math.exp %306 : vector<2x32xf32>
    %cst_52 = arith.constant 1.000000e+00 : f32
    %308 = vector.broadcast %cst_52 : f32 to vector<2x32xf32>
    %309 = arith.addf %308, %307 : vector<2x32xf32>
    %310 = arith.divf %308, %309 : vector<2x32xf32>
    %311 = vector.extract_strided_slice %236 {offsets = [4, 0], sizes = [2, 32], strides = [1, 1]} : vector<16x32xf32> to vector<2x32xf32>
    %312 = vector.extract_strided_slice %294 {offsets = [0, 256], sizes = [2, 32], strides = [1, 1]} : vector<2x384xf32> to vector<2x32xf32>
    %313 = vector.broadcast %238 : vector<1x32xf32> to vector<2x32xf32>
    %314 = arith.addf %312, %313 : vector<2x32xf32>
    %315 = arith.mulf %302, %314 : vector<2x32xf32>
    %316 = arith.addf %311, %315 : vector<2x32xf32>
    %317 = math.tanh %316 : vector<2x32xf32>
    %318 = arith.subf %293, %317 : vector<2x32xf32>
    %319 = arith.mulf %310, %318 : vector<2x32xf32>
    %320 = arith.addf %317, %319 : vector<2x32xf32>
    %cst_53 = arith.constant dense<0.000000e+00> : vector<2x384xf32>
    %321 = tpu.matmul %320, %237, %cst_53 {dimension_numbers = #tpu.dot_dimension_numbers<[1], [0], [0], [1], [0, 0, 1, 1], [], []>} : vector<2x32xf32>, vector<32x384xf32>, vector<2x384xf32> -> vector<2x384xf32>
    %322 = vector.extract_strided_slice %234 {offsets = [6, 0], sizes = [2, 32], strides = [1, 1]} : vector<16x32xf32> to vector<2x32xf32>
    %323 = vector.extract_strided_slice %321 {offsets = [0, 0], sizes = [2, 32], strides = [1, 1]} : vector<2x384xf32> to vector<2x32xf32>
    %324 = arith.addf %322, %323 : vector<2x32xf32>
    %325 = arith.negf %324 : vector<2x32xf32>
    %326 = math.exp %325 : vector<2x32xf32>
    %cst_54 = arith.constant 1.000000e+00 : f32
    %327 = vector.broadcast %cst_54 : f32 to vector<2x32xf32>
    %328 = arith.addf %327, %326 : vector<2x32xf32>
    %329 = arith.divf %327, %328 : vector<2x32xf32>
    %330 = vector.extract_strided_slice %235 {offsets = [6, 0], sizes = [2, 32], strides = [1, 1]} : vector<16x32xf32> to vector<2x32xf32>
    %331 = vector.extract_strided_slice %321 {offsets = [0, 128], sizes = [2, 32], strides = [1, 1]} : vector<2x384xf32> to vector<2x32xf32>
    %332 = arith.addf %330, %331 : vector<2x32xf32>
    %333 = arith.negf %332 : vector<2x32xf32>
    %334 = math.exp %333 : vector<2x32xf32>
    %cst_55 = arith.constant 1.000000e+00 : f32
    %335 = vector.broadcast %cst_55 : f32 to vector<2x32xf32>
    %336 = arith.addf %335, %334 : vector<2x32xf32>
    %337 = arith.divf %335, %336 : vector<2x32xf32>
    %338 = vector.extract_strided_slice %236 {offsets = [6, 0], sizes = [2, 32], strides = [1, 1]} : vector<16x32xf32> to vector<2x32xf32>
    %339 = vector.extract_strided_slice %321 {offsets = [0, 256], sizes = [2, 32], strides = [1, 1]} : vector<2x384xf32> to vector<2x32xf32>
    %340 = vector.broadcast %238 : vector<1x32xf32> to vector<2x32xf32>
    %341 = arith.addf %339, %340 : vector<2x32xf32>
    %342 = arith.mulf %329, %341 : vector<2x32xf32>
    %343 = arith.addf %338, %342 : vector<2x32xf32>
    %344 = math.tanh %343 : vector<2x32xf32>
    %345 = arith.subf %320, %344 : vector<2x32xf32>
    %346 = arith.mulf %337, %345 : vector<2x32xf32>
    %347 = arith.addf %344, %346 : vector<2x32xf32>
    %cst_56 = arith.constant dense<0.000000e+00> : vector<2x384xf32>
    %348 = tpu.matmul %347, %237, %cst_56 {dimension_numbers = #tpu.dot_dimension_numbers<[1], [0], [0], [1], [0, 0, 1, 1], [], []>} : vector<2x32xf32>, vector<32x384xf32>, vector<2x384xf32> -> vector<2x384xf32>
    %349 = vector.extract_strided_slice %234 {offsets = [8, 0], sizes = [2, 32], strides = [1, 1]} : vector<16x32xf32> to vector<2x32xf32>
    %350 = vector.extract_strided_slice %348 {offsets = [0, 0], sizes = [2, 32], strides = [1, 1]} : vector<2x384xf32> to vector<2x32xf32>
    %351 = arith.addf %349, %350 : vector<2x32xf32>
    %352 = arith.negf %351 : vector<2x32xf32>
    %353 = math.exp %352 : vector<2x32xf32>
    %cst_57 = arith.constant 1.000000e+00 : f32
    %354 = vector.broadcast %cst_57 : f32 to vector<2x32xf32>
    %355 = arith.addf %354, %353 : vector<2x32xf32>
    %356 = arith.divf %354, %355 : vector<2x32xf32>
    %357 = vector.extract_strided_slice %235 {offsets = [8, 0], sizes = [2, 32], strides = [1, 1]} : vector<16x32xf32> to vector<2x32xf32>
    %358 = vector.extract_strided_slice %348 {offsets = [0, 128], sizes = [2, 32], strides = [1, 1]} : vector<2x384xf32> to vector<2x32xf32>
    %359 = arith.addf %357, %358 : vector<2x32xf32>
    %360 = arith.negf %359 : vector<2x32xf32>
    %361 = math.exp %360 : vector<2x32xf32>
    %cst_58 = arith.constant 1.000000e+00 : f32
    %362 = vector.broadcast %cst_58 : f32 to vector<2x32xf32>
    %363 = arith.addf %362, %361 : vector<2x32xf32>
    %364 = arith.divf %362, %363 : vector<2x32xf32>
    %365 = vector.extract_strided_slice %236 {offsets = [8, 0], sizes = [2, 32], strides = [1, 1]} : vector<16x32xf32> to vector<2x32xf32>
    %366 = vector.extract_strided_slice %348 {offsets = [0, 256], sizes = [2, 32], strides = [1, 1]} : vector<2x384xf32> to vector<2x32xf32>
    %367 = vector.broadcast %238 : vector<1x32xf32> to vector<2x32xf32>
    %368 = arith.addf %366, %367 : vector<2x32xf32>
    %369 = arith.mulf %356, %368 : vector<2x32xf32>
    %370 = arith.addf %365, %369 : vector<2x32xf32>
    %371 = math.tanh %370 : vector<2x32xf32>
    %372 = arith.subf %347, %371 : vector<2x32xf32>
    %373 = arith.mulf %364, %372 : vector<2x32xf32>
    %374 = arith.addf %371, %373 : vector<2x32xf32>
    %cst_59 = arith.constant dense<0.000000e+00> : vector<2x384xf32>
    %375 = tpu.matmul %374, %237, %cst_59 {dimension_numbers = #tpu.dot_dimension_numbers<[1], [0], [0], [1], [0, 0, 1, 1], [], []>} : vector<2x32xf32>, vector<32x384xf32>, vector<2x384xf32> -> vector<2x384xf32>
    %376 = vector.extract_strided_slice %234 {offsets = [10, 0], sizes = [2, 32], strides = [1, 1]} : vector<16x32xf32> to vector<2x32xf32>
    %377 = vector.extract_strided_slice %375 {offsets = [0, 0], sizes = [2, 32], strides = [1, 1]} : vector<2x384xf32> to vector<2x32xf32>
    %378 = arith.addf %376, %377 : vector<2x32xf32>
    %379 = arith.negf %378 : vector<2x32xf32>
    %380 = math.exp %379 : vector<2x32xf32>
    %cst_60 = arith.constant 1.000000e+00 : f32
    %381 = vector.broadcast %cst_60 : f32 to vector<2x32xf32>
    %382 = arith.addf %381, %380 : vector<2x32xf32>
    %383 = arith.divf %381, %382 : vector<2x32xf32>
    %384 = vector.extract_strided_slice %235 {offsets = [10, 0], sizes = [2, 32], strides = [1, 1]} : vector<16x32xf32> to vector<2x32xf32>
    %385 = vector.extract_strided_slice %375 {offsets = [0, 128], sizes = [2, 32], strides = [1, 1]} : vector<2x384xf32> to vector<2x32xf32>
    %386 = arith.addf %384, %385 : vector<2x32xf32>
    %387 = arith.negf %386 : vector<2x32xf32>
    %388 = math.exp %387 : vector<2x32xf32>
    %cst_61 = arith.constant 1.000000e+00 : f32
    %389 = vector.broadcast %cst_61 : f32 to vector<2x32xf32>
    %390 = arith.addf %389, %388 : vector<2x32xf32>
    %391 = arith.divf %389, %390 : vector<2x32xf32>
    %392 = vector.extract_strided_slice %236 {offsets = [10, 0], sizes = [2, 32], strides = [1, 1]} : vector<16x32xf32> to vector<2x32xf32>
    %393 = vector.extract_strided_slice %375 {offsets = [0, 256], sizes = [2, 32], strides = [1, 1]} : vector<2x384xf32> to vector<2x32xf32>
    %394 = vector.broadcast %238 : vector<1x32xf32> to vector<2x32xf32>
    %395 = arith.addf %393, %394 : vector<2x32xf32>
    %396 = arith.mulf %383, %395 : vector<2x32xf32>
    %397 = arith.addf %392, %396 : vector<2x32xf32>
    %398 = math.tanh %397 : vector<2x32xf32>
    %399 = arith.subf %374, %398 : vector<2x32xf32>
    %400 = arith.mulf %391, %399 : vector<2x32xf32>
    %401 = arith.addf %398, %400 : vector<2x32xf32>
    %cst_62 = arith.constant dense<0.000000e+00> : vector<2x384xf32>
    %402 = tpu.matmul %401, %237, %cst_62 {dimension_numbers = #tpu.dot_dimension_numbers<[1], [0], [0], [1], [0, 0, 1, 1], [], []>} : vector<2x32xf32>, vector<32x384xf32>, vector<2x384xf32> -> vector<2x384xf32>
    %403 = vector.extract_strided_slice %234 {offsets = [12, 0], sizes = [2, 32], strides = [1, 1]} : vector<16x32xf32> to vector<2x32xf32>
    %404 = vector.extract_strided_slice %402 {offsets = [0, 0], sizes = [2, 32], strides = [1, 1]} : vector<2x384xf32> to vector<2x32xf32>
    %405 = arith.addf %403, %404 : vector<2x32xf32>
    %406 = arith.negf %405 : vector<2x32xf32>
    %407 = math.exp %406 : vector<2x32xf32>
    %cst_63 = arith.constant 1.000000e+00 : f32
    %408 = vector.broadcast %cst_63 : f32 to vector<2x32xf32>
    %409 = arith.addf %408, %407 : vector<2x32xf32>
    %410 = arith.divf %408, %409 : vector<2x32xf32>
    %411 = vector.extract_strided_slice %235 {offsets = [12, 0], sizes = [2, 32], strides = [1, 1]} : vector<16x32xf32> to vector<2x32xf32>
    %412 = vector.extract_strided_slice %402 {offsets = [0, 128], sizes = [2, 32], strides = [1, 1]} : vector<2x384xf32> to vector<2x32xf32>
    %413 = arith.addf %411, %412 : vector<2x32xf32>
    %414 = arith.negf %413 : vector<2x32xf32>
    %415 = math.exp %414 : vector<2x32xf32>
    %cst_64 = arith.constant 1.000000e+00 : f32
    %416 = vector.broadcast %cst_64 : f32 to vector<2x32xf32>
    %417 = arith.addf %416, %415 : vector<2x32xf32>
    %418 = arith.divf %416, %417 : vector<2x32xf32>
    %419 = vector.extract_strided_slice %236 {offsets = [12, 0], sizes = [2, 32], strides = [1, 1]} : vector<16x32xf32> to vector<2x32xf32>
    %420 = vector.extract_strided_slice %402 {offsets = [0, 256], sizes = [2, 32], strides = [1, 1]} : vector<2x384xf32> to vector<2x32xf32>
    %421 = vector.broadcast %238 : vector<1x32xf32> to vector<2x32xf32>
    %422 = arith.addf %420, %421 : vector<2x32xf32>
    %423 = arith.mulf %410, %422 : vector<2x32xf32>
    %424 = arith.addf %419, %423 : vector<2x32xf32>
    %425 = math.tanh %424 : vector<2x32xf32>
    %426 = arith.subf %401, %425 : vector<2x32xf32>
    %427 = arith.mulf %418, %426 : vector<2x32xf32>
    %428 = arith.addf %425, %427 : vector<2x32xf32>
    %cst_65 = arith.constant dense<0.000000e+00> : vector<2x384xf32>
    %429 = tpu.matmul %428, %237, %cst_65 {dimension_numbers = #tpu.dot_dimension_numbers<[1], [0], [0], [1], [0, 0, 1, 1], [], []>} : vector<2x32xf32>, vector<32x384xf32>, vector<2x384xf32> -> vector<2x384xf32>
    %430 = vector.extract_strided_slice %234 {offsets = [14, 0], sizes = [2, 32], strides = [1, 1]} : vector<16x32xf32> to vector<2x32xf32>
    %431 = vector.extract_strided_slice %429 {offsets = [0, 0], sizes = [2, 32], strides = [1, 1]} : vector<2x384xf32> to vector<2x32xf32>
    %432 = arith.addf %430, %431 : vector<2x32xf32>
    %433 = arith.negf %432 : vector<2x32xf32>
    %434 = math.exp %433 : vector<2x32xf32>
    %cst_66 = arith.constant 1.000000e+00 : f32
    %435 = vector.broadcast %cst_66 : f32 to vector<2x32xf32>
    %436 = arith.addf %435, %434 : vector<2x32xf32>
    %437 = arith.divf %435, %436 : vector<2x32xf32>
    %438 = vector.extract_strided_slice %235 {offsets = [14, 0], sizes = [2, 32], strides = [1, 1]} : vector<16x32xf32> to vector<2x32xf32>
    %439 = vector.extract_strided_slice %429 {offsets = [0, 128], sizes = [2, 32], strides = [1, 1]} : vector<2x384xf32> to vector<2x32xf32>
    %440 = arith.addf %438, %439 : vector<2x32xf32>
    %441 = arith.negf %440 : vector<2x32xf32>
    %442 = math.exp %441 : vector<2x32xf32>
    %cst_67 = arith.constant 1.000000e+00 : f32
    %443 = vector.broadcast %cst_67 : f32 to vector<2x32xf32>
    %444 = arith.addf %443, %442 : vector<2x32xf32>
    %445 = arith.divf %443, %444 : vector<2x32xf32>
    %446 = vector.extract_strided_slice %236 {offsets = [14, 0], sizes = [2, 32], strides = [1, 1]} : vector<16x32xf32> to vector<2x32xf32>
    %447 = vector.extract_strided_slice %429 {offsets = [0, 256], sizes = [2, 32], strides = [1, 1]} : vector<2x384xf32> to vector<2x32xf32>
    %448 = vector.broadcast %238 : vector<1x32xf32> to vector<2x32xf32>
    %449 = arith.addf %447, %448 : vector<2x32xf32>
    %450 = arith.mulf %437, %449 : vector<2x32xf32>
    %451 = arith.addf %446, %450 : vector<2x32xf32>
    %452 = math.tanh %451 : vector<2x32xf32>
    %453 = arith.subf %428, %452 : vector<2x32xf32>
    %454 = arith.mulf %445, %453 : vector<2x32xf32>
    %455 = arith.addf %452, %454 : vector<2x32xf32>
    %456 = tpu.concatenate %266, %293, %320, %347, %374, %401, %428, %455 in 0 : vector<2x32xf32>, vector<2x32xf32>, vector<2x32xf32>, vector<2x32xf32>, vector<2x32xf32>, vector<2x32xf32>, vector<2x32xf32>, vector<2x32xf32> -> vector<16x32xf32>
    %c0_68 = arith.constant 0 : index
    %c0_69 = arith.constant 0 : index
    %457 = vector.load %arg10[%c0_68, %c0_69] : memref<32x32xf32, #tpu.memory_space<vmem>>, vector<32x32xf32>
    %cst_70 = arith.constant dense<0.000000e+00> : vector<16x32xf32>
    %458 = tpu.matmul %456, %457, %cst_70 {dimension_numbers = #tpu.dot_dimension_numbers<[1], [0], [0], [1], [0, 0, 1, 1], [], []>} : vector<16x32xf32>, vector<32x32xf32>, vector<16x32xf32> -> vector<16x32xf32>
    %c0_71 = arith.constant 0 : index
    %c0_72 = arith.constant 0 : index
    %459 = vector.load %arg11[%c0_71, %c0_72] : memref<1x32xf32, #tpu.memory_space<vmem>>, vector<1x32xf32>
    %460 = vector.broadcast %459 : vector<1x32xf32> to vector<16x32xf32>
    %461 = arith.addf %458, %460 : vector<16x32xf32>
    %462 = arith.negf %461 : vector<16x32xf32>
    %463 = math.exp %462 : vector<16x32xf32>
    %cst_73 = arith.constant 1.000000e+00 : f32
    %464 = vector.broadcast %cst_73 : f32 to vector<16x32xf32>
    %465 = arith.addf %464, %463 : vector<16x32xf32>
    %466 = arith.divf %464, %465 : vector<16x32xf32>
    %c0_74 = arith.constant 0 : index
    %c0_75 = arith.constant 0 : index
    %467 = vector.load %arg12[%c0_74, %c0_75] : memref<16x32xf32, #tpu.memory_space<vmem>>, vector<16x32xf32>
    tpu.vector_store %arg12[%c0_74, %c0_75], %466 {strides = array<i32>} : memref<16x32xf32, #tpu.memory_space<vmem>>, vector<16x32xf32>,
    return
  }
  func.func @transform_0(%arg0: i32) -> (i32, i32) {
    %c0_i32 = arith.constant 0 : i32
    %c0_i32_0 = arith.constant 0 : i32
    %c0_i32_1 = arith.constant 0 : i32
    return %c0_i32, %c0_i32_0 : i32, i32
  }
  func.func @transform_1(%arg0: i32) -> (i32, i32) {
    %c0_i32 = arith.constant 0 : i32
    %c0_i32_0 = arith.constant 0 : i32
    %c0_i32_1 = arith.constant 0 : i32
    return %c0_i32, %c0_i32_0 : i32, i32
  }
  func.func @transform_2(%arg0: i32) -> (i32, i32) {
    %c0_i32 = arith.constant 0 : i32
    %c0_i32_0 = arith.constant 0 : i32
    %c0_i32_1 = arith.constant 0 : i32
    return %c0_i32, %c0_i32_0 : i32, i32
  }
  func.func @transform_3(%arg0: i32) -> (i32, i32) {
    %c0_i32 = arith.constant 0 : i32
    %c0_i32_0 = arith.constant 0 : i32
    %c0_i32_1 = arith.constant 0 : i32
    return %c0_i32, %c0_i32_0 : i32, i32
  }
  func.func @transform_4(%arg0: i32) -> (i32, i32) {
    %c0_i32 = arith.constant 0 : i32
    %c0_i32_0 = arith.constant 0 : i32
    %c0_i32_1 = arith.constant 0 : i32
    return %c0_i32, %c0_i32_0 : i32, i32
  }
  func.func @transform_5(%arg0: i32) -> (i32, i32) {
    %c0_i32 = arith.constant 0 : i32
    %c0_i32_0 = arith.constant 0 : i32
    %c0_i32_1 = arith.constant 0 : i32
    return %c0_i32, %c0_i32_0 : i32, i32
  }
  func.func @transform_6(%arg0: i32) -> (i32, i32) {
    %c0_i32 = arith.constant 0 : i32
    %c0_i32_0 = arith.constant 0 : i32
    %c0_i32_1 = arith.constant 0 : i32
    return %c0_i32, %c0_i32_0 : i32, i32
  }
  func.func @transform_7(%arg0: i32) -> (i32, i32) {
    %c0_i32 = arith.constant 0 : i32
    %c0_i32_0 = arith.constant 0 : i32
    %c0_i32_1 = arith.constant 0 : i32
    return %c0_i32, %c0_i32_0 : i32, i32
  }
  func.func @transform_8(%arg0: i32) -> (i32, i32) {
    %c0_i32 = arith.constant 0 : i32
    %c0_i32_0 = arith.constant 0 : i32
    %c0_i32_1 = arith.constant 0 : i32
    return %c0_i32, %c0_i32_0 : i32, i32
  }
  func.func @transform_9(%arg0: i32) -> (i32, i32) {
    %c0_i32 = arith.constant 0 : i32
    %c0_i32_0 = arith.constant 0 : i32
    %c0_i32_1 = arith.constant 0 : i32
    return %c0_i32, %c0_i32_0 : i32, i32
  }
  func.func @transform_10(%arg0: i32) -> (i32, i32) {
    %c0_i32 = arith.constant 0 : i32
    %c0_i32_0 = arith.constant 0 : i32
    %c0_i32_1 = arith.constant 0 : i32
    return %c0_i32, %c0_i32_0 : i32, i32
  }
  func.func @transform_11(%arg0: i32) -> (i32, i32) {
    %c0_i32 = arith.constant 0 : i32
    %c0_i32_0 = arith.constant 0 : i32
    %c0_i32_1 = arith.constant 0 : i32
    return %c0_i32, %c0_i32_0 : i32, i32
  }
}

</mosaic_0001>

<bundles_post_ra>
// kernel: generator_forward.1
= control target key start
LH: loop header
LB: loop body
LE: loop exit
PB: predicated region body
PF: predicated region fallthrough
CT: control target
= control target key end

     0   :  { %16 = vsyncpa [#allocation3], 0  ;;  %s5040_s0 = inlined_call_operand.vmem [shape: f32[16,4], index: 0, kind: input, shape index: {}]   ;;  %s5041_s1 = inlined_call_operand.vmem [shape: f32[4,384], index: 1, kind: input, shape index: {}]   ;;  %s5042_s2 = inlined_call_operand.hbm [shape: f32[32,384], index: 2, kind: input, shape index: {}]   ;;  %s5043_s3 = inlined_call_operand.hbm [shape: f32[1,384], index: 3, kind: input, shape index: {}]   ;;  %s5044_s4 = inlined_call_operand.vmem [shape: f32[1,32], index: 4, kind: input, shape index: {}]   ;;  %s5045_s5 = inlined_call_operand.hbm [shape: f32[32,384], index: 5, kind: input, shape index: {}]   ;;  %s5046_s6 = inlined_call_operand.hbm [shape: f32[32,384], index: 6, kind: input, shape index: {}]   ;;  %s5047_s7 = inlined_call_operand.vmem [shape: f32[1,384], index: 7, kind: input, shape index: {}]   ;;  %s5048_s8 = inlined_call_operand.vmem [shape: f32[1,32], index: 8, kind: input, shape index: {}]   ;;  %s5049_s9 = inlined_call_operand.vmem [shape: f32[32,32], index: 9, kind: input, shape index: {}]   ;;  %s5050_s10 = inlined_call_operand.hbm [shape: f32[1,32], index: 10, kind: input, shape index: {}]   ;;  %s5051_s11 = inlined_call_operand.vmem [shape: f32[16,32], index: 11, kind: output, shape index: {}]  }
   0x1   :  { %17 = vsyncpa [#allocation5], 0 }
   0x2   :  { %18 = vsyncpa [#allocation8], 0  ;;  %s4403_s17 = smov [#allocation4]   ;;  %s4287_s21 = scalar_lea.hbm %s5043_s3, 48 }
   0x3   :  { %s41_s18 = sshll.u32 %s4403_s17, 4  ;;  %p4288_p0 = scmp.ne.s32.totalorder %s5043_s3, %s4287_s21  ;;  %s42_s18 = int_to_ptr.vmem [resolvable:$true] %s41_s18 }
   0x4   :  { %p4291_p1 = scmp.lt.u32.totalorder %s4287_s21, %s5043_s3 }
   0x6   :  { %p4293_p2 = pnand %p4291_p1, %p4288_p0 }
   0x8   :  { %4296 = shalt.err (!%p4293_p2)
}
   0x9   :  { %s4297_s26 = scalar_lea.vmem %s42_s18, 48  ;;  %s4301_s27 = scalar_lea.vmem %s42_s18, 64 }
   0xa   :  { %p4298_p3 = scmp.ne.s32.totalorder %s42_s18, %s4297_s26  ;;  %p4302_p4 = scmp.lt.s32.totalorder %s42_s18, %s42_s18 }
   0xb   :  { %p4303_p5 = scmp.lt.s32.totalorder %s4301_s27, %s4297_s26 }
   0xd   :  { %p4304_p6 = por %p4303_p5, %p4302_p4 }
   0xf   :  { %p4305_p7 = pnand %p4304_p6, %p4298_p3 }
  0x11   :  { %4308 = shalt.err (!%p4305_p7)
}
  0x12   :  { %44 = dma.hbm_to_vmem [thread:$0]  %s5043_s3, 48, %s42_s18, [#allocation5]  }
  0x13   :  { %s4404_s30 = smov [#allocation7]   ;;  %s4405_s13 = smov [#allocation2]  }
  0x14   :  { %s64_s12 = sshll.u32 %s4404_s30, 4  ;;  %s28_s14 = sshll.u32 %s4405_s13, 4  ;;  %s65_s12 = int_to_ptr.vmem [resolvable:$true] %s64_s12  ;;  %s29_s14 = int_to_ptr.vmem [resolvable:$true] %s28_s14 }
  0x15   :  { %s4309_s17 = scalar_lea.hbm %s5046_s6, 1536 }
  0x16   :  { %p4310_p8 = scmp.ne.s32.totalorder %s5046_s6, %s4309_s17  ;;  %p4313_p9 = scmp.lt.u32.totalorder %s4309_s17, %s5046_s6 }
  0x18   :  { %p4315_p10 = pnand %p4313_p9, %p4310_p8 }
  0x1a   :  { %4318 = shalt.err (!%p4315_p10)
}
  0x1b   :  { %s4319_s3 = scalar_lea.vmem %s65_s12, 1536  ;;  %p4324_p12 = scmp.lt.s32.totalorder %s65_s12, %s65_s12 }
  0x1c   :  { %p4320_p11 = scmp.ne.s32.totalorder %s65_s12, %s4319_s3  ;;  %p4325_p13 = scmp.lt.s32.totalorder %s4319_s3, %s4319_s3 }
  0x1e   :  { %p4326_p0 = por %p4325_p13, %p4324_p12 }
  0x20   :  { %p4327_p1 = pnand %p4326_p0, %p4320_p11 }
  0x22   :  { %4330 = shalt.err (!%p4327_p1)
}
  0x23   :  { %s4406_s18 = smov 384   ;;  %s4407_s23 = smov 24  }
  0x24   :  { %70 = dma.hbm_to_vmem [thread:$0]  %s5046_s6, 1536, %s65_s12, [#allocation8], %s4406_s18, %s4406_s18, %s4407_s23  }
  0x25   :  { %s4331_s28 = scalar_lea.hbm %s5042_s2, 1536 }
  0x26   :  { %p4332_p2 = scmp.ne.s32.totalorder %s5042_s2, %s4331_s28  ;;  %p4335_p3 = scmp.lt.u32.totalorder %s4331_s28, %s5042_s2 }
  0x28   :  { %p4337_p4 = pnand %p4335_p3, %p4332_p2 }
  0x2a   :  { %4340 = shalt.err (!%p4337_p4)
}
  0x2b   :  { %s4341_s16 = scalar_lea.vmem %s29_s14, 1536  ;;  %p4346_p6 = scmp.lt.s32.totalorder %s29_s14, %s29_s14 }
  0x2c   :  { %p4342_p5 = scmp.ne.s32.totalorder %s29_s14, %s4341_s16  ;;  %p4347_p7 = scmp.lt.s32.totalorder %s4341_s16, %s4341_s16 }
  0x2e   :  { %p4348_p8 = por %p4347_p7, %p4346_p6 }
  0x30   :  { %p4349_p9 = pnand %p4348_p8, %p4342_p5 }
  0x32   :  { %4352 = shalt.err (!%p4349_p9)
}
  0x33   :  { %34 = dma.hbm_to_vmem [thread:$0]  %s5042_s2, 1536, %s29_s14, [#allocation3], %s4406_s18, %s4406_s18, %s4407_s23  }
  0x34   :  { %s4408_s17 = smov [#allocation6]   ;;  %s4409_s20 = smov [#allocation9]  }
  0x35   :  { %s52_s19 = sshll.u32 %s4408_s17, 4  ;;  %s83_s21 = sshll.u32 %s4409_s20, 4  ;;  %s53_s19 = int_to_ptr.vmem [resolvable:$true] %s52_s19  ;;  %s84_s21 = int_to_ptr.vmem [resolvable:$true] %s83_s21 }
  0x36   :  { %s4353_s24 = scalar_lea.hbm %s5045_s5, 1536 }
  0x37   :  { %p4354_p10 = scmp.ne.s32.totalorder %s5045_s5, %s4353_s24  ;;  %p4357_p11 = scmp.lt.u32.totalorder %s4353_s24, %s5045_s5 }
  0x39   :  { %p4359_p12 = pnand %p4357_p11, %p4354_p10 }
  0x3b   :  { %4362 = shalt.err (!%p4359_p12)
}
  0x3c   :  { %s4363_s2 = scalar_lea.vmem %s53_s19, 1536  ;;  %p4368_p0 = scmp.lt.s32.totalorder %s53_s19, %s53_s19 }
  0x3d   :  { %p4364_p13 = scmp.ne.s32.totalorder %s53_s19, %s4363_s2  ;;  %p4369_p1 = scmp.lt.s32.totalorder %s4363_s2, %s4363_s2 }
  0x3f   :  { %p4370_p2 = por %p4369_p1, %p4368_p0 }
  0x41   :  { %p4371_p3 = pnand %p4370_p2, %p4364_p13 }
  0x43   :  { %4374 = shalt.err (!%p4371_p3)
}
  0x44   :  { %58 = dma.hbm_to_vmem [thread:$0]  %s5045_s5, 1536, %s53_s19, [#allocation5], %s4406_s18, %s4406_s18, %s4407_s23  }
  0x45   :  { %s4375_s15 = scalar_lea.hbm %s5050_s10, 16 }
  0x46   :  { %p4376_p4 = scmp.ne.s32.totalorder %s5050_s10, %s4375_s15  ;;  %p4379_p5 = scmp.lt.u32.totalorder %s4375_s15, %s5050_s10 }
  0x48   :  { %p4381_p6 = pnand %p4379_p5, %p4376_p4 }
  0x4a   :  { %4384 = shalt.err (!%p4381_p6)
}
  0x4b   :  { %s4385_s20 = scalar_lea.vmem %s84_s21, 16  ;;  %s4389_s22 = scalar_lea.vmem %s84_s21, 32 }
  0x4c   :  { %p4386_p7 = scmp.ne.s32.totalorder %s84_s21, %s4385_s20  ;;  %p4390_p8 = scmp.lt.s32.totalorder %s84_s21, %s84_s21 }
  0x4d   :  { %p4391_p9 = scmp.lt.s32.totalorder %s4389_s22, %s4385_s20 }
  0x4f   :  { %p4392_p10 = por %p4391_p9, %p4390_p8 }
  0x51   :  { %p4393_p11 = pnand %p4392_p10, %p4386_p7 }
  0x53   :  { %4396 = shalt.err (!%p4393_p11)
}
  0x54   :  { %86 = dma.hbm_to_vmem [thread:$0]  %s5050_s10, 16, %s84_s21, [#allocation8]  }
  0x55   :  { %4397 = dma.done.wait [#allocation3], 1536  }
  0x56   :  { %4398 = vsyncadd [#allocation3], 4294965760 }
  0x57   :  { %4399 = dma.done.wait [#allocation5], 1584  }
  0x58   :  { %4400 = vsyncadd [#allocation5], 4294965712 }
  0x59   :  { %4401 = dma.done.wait [#allocation8], 1552  }
  0x5a   :  { %4402 = vsyncadd [#allocation8], 4294965744  ;;  %v4410_v0 = vmov 0.0   ;;  %v104_v1 = vld [vmem:[%s5041_s1] sm:$0xff]  ;;  %vm133_vm0 = vcmask 1043456   ;;  %vm126_vm1 = vcmask 31744   ;;  %v108_v25 = vlaneseq }
  0x5b   :  { %204 = vmatprep.mubr.f32.mxu0 %v4410_v0  ;;  %v102_v2 = vld [vmem:[%s5040_s0] sm:$0xff]  ;;  %v293_v3 = vld [vmem:[#allocation2 + $0x8] sm:$0xff]  ;;  %v125_v4 = vcombine.high %v104_v1, %v104_v1  ;;  %v295_v7 = vld [vmem:[#allocation2 + $0x18] sm:$0xff]  ;;  %v4411_v23 = vmov 0.0|0.0   ;;  %vm4412_vm2 = vmmov 0   ;;  %vm305_vm3 = vcmask 261120  }
  0x5c   :  { %v296_v5 = vld [vmem:[#allocation2 + $0x20] sm:$0xff]  ;;  %3659 = vmatprep.mubr.msk.f32.mxu1 %vm126_vm1, %v102_v2  ;;  %v299_v10 = vld [vmem:[#allocation2 + $0x38] sm:$0xff]  ;;  %v302_v11 = vld [vmem:[#allocation2 + $0x50] sm:$0xff]  ;;  %v4602_v26 = vshrl.u32 %v108_v25, 7  ;;  %vm1733_vm4 = vcmask 1041408   ;;  %vm1736_vm5 = vcmask 1045504  }
  0x5d   :  { %v292_v6 = vld [vmem:[#allocation2] sm:$0xff]  ;;  %v4550_v8 = vpack.c.bf16 %v296_v5, %v293_v3  ;;  %3484 = vmatprep.subr.msk.mxu0 %vm133_vm0, %v125_v4  ;;  %v4555_v12 = vpack.c.bf16 %v302_v11, %v299_v10  ;;  %v298_v13 = vld [vmem:[#allocation2 + $0x30] sm:$0xff]  ;;  %v301_v14 = vld [vmem:[#allocation2 + $0x48] sm:$0xff] }
  0x5e   :  { %v4552_v9 = vpack.c.bf16 %v295_v7, %v292_v6  ;;  %v105_v15 = vld [vmem:[%s5041_s1 + $0x8] sm:$0xf]  ;;  %3485 = vmatpush1.msk.msra.mxu0 %vm133_vm0, %v104_v1  ;;  %v294_v16 = vld [vmem:[#allocation2 + $0x10] sm:$0xff]  ;;  %v4571_v20 = vpack.c.bf16 %v301_v14, %v298_v13  ;;  %v300_v21 = vld [vmem:[#allocation2 + $0x40] sm:$0xff]  ;;  %v118_v27 = vsub.s32 2, %v4602_v26  ;;  %v110_v29 = vsub.s32 0, %v4602_v26 }
  0x5f   :  { %3657 = vmatprep.subr.msk.mxu1 %vm133_vm0, %v105_v15  ;;  %v297_v17 = vld [vmem:[#allocation2 + $0x28] sm:$0xff]  ;;  %3486 = vmatmul.mubr.msk.f32.vlgmr.msra.gmra.mrb[0].mxu0 %vm126_vm1, %v102_v2  ;;  %v303_v22 = vld [vmem:[#allocation2 + $0x58] sm:$0xff]  ;;  %v106_v28 = vld [vmem:[#allocation4] sm:$0x7]  ;;  %v114_v31 = vsub.s32 1, %v4602_v26 }
  0x60   :  { %3861 = vmatprep.subr.bf16.mxu0 %v4550_v8  ;;  %v4564_v18 = vpack.c.bf16 %v297_v17, %v294_v16  ;;  %210 = vmatprep.mubr.f32.mxu0 %v4410_v0  ;;  %v103_v19 = vld [vmem:[%s5040_s0 + $0x8] sm:$0xff]  ;;  %v4579_v24 = vpack.c.bf16 %v303_v22, %v300_v21  ;;  %v119_v32 = vrot.slane %v106_v28, %v118_v27  ;;  %v4628_v55 = vld [vmem:[%s5044_s4] ss:$0 sm:$0xff] }
  0x61   :  { %3863 = vmatpush1.bf16.msra.mxu0 %v4552_v9  ;;  %3658 = vmatpush3.msk.msra.mxu1 %vm133_vm0, %v105_v15  ;;  %v111_v34 = vrot.slane %v106_v28, %v110_v29  ;;  %v115_v36 = vrot.slane %v106_v28, %v114_v31  ;;  %v4860_v26 = vld [vmem:[%s5048_s8] ss:$0 sm:$0xff] }
  0x62   :  { %3865 = vmatprep.subr.bf16.mxu0 %v4555_v12  ;;  %3868 = vmatprep.subr.bf16.mxu1 %v4411_v23 }
  0x63   :  { %3660 = vmatmul.mubr.msk.f32.vlgmr.msra.gmra.mrb[0].mxu1 %vm126_vm1, %v103_v19  ;;  %3487 = vmatmul.mubr.msk.f32.gmra.mrb[2].mxu0 %vm126_vm1, %v103_v19 }
  0x64   :  { %3870 = vmatpush3.bf16.msra.mxu1 %v4564_v18  ;;  %373 = vmatprep.mubr.f32.mxu0 %v4410_v0 }
  0x65   :  { %3867 = vmatpush1.bf16.msra.mxu0 %v4571_v20  ;;  %3871 = vmatprep.subr.bf16.mxu1 %v4411_v23 }
  0x66   :  { %3670 = vmatprep.mubr.msk.f32.mxu1 %vm4412_vm2, %v4410_v0  ;;  %3875 = vmatprep.subr.bf16.mxu0 %v4550_v8 }
  0x68   :  { %374 = vmatmul.mubr.f32.vlgmr.msra.gmra.mrb[4].mxu0 %v4410_v0  ;;  %3873 = vmatpush3.bf16.msra.mxu1 %v4579_v24 }
  0x69   :  { %3882 = vmatprep.subr.bf16.mxu1 %v4411_v23  ;;  %3877 = vmatpush1.bf16.msra.mxu0 %v4552_v9 }
  0x6a   :  { %3879 = vmatprep.subr.bf16.mxu0 %v4555_v12  ;;  %544 = vmatprep.mubr.f32.mxu0 %v4410_v0 }
  0x6b   :  { %3671 = vmatmul.mubr.f32.vlgmr.msra.gmra.mrb[2].mxu1 %v4410_v0 }
  0x6c   :  { %3884 = vmatpush3.bf16.msra.mxu1 %v4564_v18  ;;  %3681 = vmatprep.mubr.msk.f32.mxu1 %vm4412_vm2, %v4410_v0 }
  0x6d   :  { %3885 = vmatprep.subr.bf16.mxu1 %v4411_v23  ;;  %3881 = vmatpush1.bf16.msra.mxu0 %v4571_v20 }
  0x6e   :  { %3889 = vmatprep.subr.bf16.mxu0 %v4550_v8 }
  0x70   :  { %3887 = vmatpush3.bf16.msra.mxu1 %v4579_v24 }
  0x71   :  { %3896 = vmatprep.subr.bf16.mxu1 %v4411_v23 }
 0x132   :  { %v206_v30 = vpop.f32.mrb[0].mxu0 }
 0x133   :  { %v208_v33 = vpop.f32.mrb[1].mxu0  ;;  %v4619_v43 = vadd.f32 %v206_v30, %v111_v34 }
 0x134   :  { %v4622_v50 = vadd.f32 %v208_v33, %v115_v36 }
 0x136   :  { %v3661_v35 = vpop.f32.mrb[0].mxu1  ;;  %v212_v37 = vpop.f32.mrb[2].mxu0 }
 0x137   :  { %v4613_v38 = vadd.f32 %v3661_v35, %v119_v32  ;;  %v283_v39 = vpop.f32.mrb[1].mxu1  ;;  %v4615_v40 = vadd.f32 %v212_v37, %v111_v34  ;;  %v214_v41 = vpop.f32.mrb[3].mxu0 }
 0x138   :  { %v4617_v42 = vadd.f32 %v214_v41, %v115_v36  ;;  %v4631_v59 = vadd.f32 %v283_v39, %v119_v32 }
 0x13b   :  { %v375_v44 = vpop.f32.mrb[4].mxu0 }
 0x13c   :  { %v450_v45 = vadd.f32 %v375_v44, %v4619_v43  ;;  %v377_v46 = vpop.f32.mrb[5].mxu0 }
 0x13d   :  { %v457_v51 = vadd.f32 %v377_v46, %v4622_v50 }
 0x13e   :  { %v3491_v47 = vmul.f32 -1.442695, %v450_v45  ;;  %v446_v48 = vpop.f32.mrb[2].mxu1 }
 0x13f   :  { %v3672_v49 = vpop.f32.mrb[3].mxu1  ;;  %v3492_v52 = vmul.f32 -1.442695, %v457_v51  ;;  %v470_v56 = vadd.f32 %v4628_v55, %v446_v48 }
 0x140   :  { %4119 = vpow2.f32 %v3491_v47 }
 0x141   :  { %4121 = vpow2.f32 %v3492_v52 }
 0x14a   :  { %v4120_v53 = vpop.eup %4119 }
 0x14b   :  { %v454_v54 = vadd.f32 1.0, %v4120_v53  ;;  %v4122_v57 = vpop.eup %4121 }
 0x14c   :  { %v461_v61 = vadd.f32 1.0, %v4122_v57 }
 0x14d   :  { %4123 = vrcp.f32 %v454_v54 }
 0x157   :  { %v4124_v58 = vpop.eup %4123 }
 0x158   :  { %v471_v60 = vmul.f32 %v4124_v58, %v470_v56 }
 0x15a   :  { %v472_v62 = vadd.f32 %v471_v60, %v4631_v59 }
 0x15c   :  { %4125 = vtanh.f32 %v472_v62 }
 0x15d   :  { %4127 = vrcp.f32 %v461_v61 }
 0x166   :  { %v4126_v63 = vpop.eup %4125 }
 0x167   :  { %v474_v1 = vsub.f32 0.0, %v4126_v63  ;;  %v4128_v2 = vpop.eup %4127 }
 0x169   :  { %v475_v3 = vmul.f32 %v4128_v2, %v474_v1 }
 0x16b   :  { %v4634_v4 = vadd.f32 %v4126_v63, %v475_v3 }
 0x16d   :  { %3494 = vmatmul.mubr.msk.f32.vlgmr.msra.gmra.mrb[6].mxu0 %vm305_vm3, %v4634_v4  ;;  %3682 = vmatmul.mubr.msk.f32.vlgmr.msra.gmra.mrb[4].mxu1 %vm305_vm3, %v4634_v4 }
 0x16e   :  { %3891 = vmatpush1.bf16.msra.mxu0 %v4552_v9  ;;  %3898 = vmatpush3.bf16.msra.mxu1 %v4564_v18 }
 0x16f   :  { %3893 = vmatprep.subr.bf16.mxu0 %v4555_v12  ;;  %3899 = vmatprep.subr.bf16.mxu1 %v4411_v23 }
 0x170   :  { %725 = vmatprep.mubr.f32.mxu0 %v4410_v0  ;;  %3692 = vmatprep.mubr.msk.f32.mxu1 %vm4412_vm2, %v4410_v0 }
 0x172   :  { %3895 = vmatpush1.bf16.msra.mxu0 %v4571_v20  ;;  %3901 = vmatpush3.bf16.msra.mxu1 %v4579_v24 }
 0x173   :  { %3903 = vmatprep.subr.bf16.mxu0 %v4550_v8  ;;  %3910 = vmatprep.subr.bf16.mxu1 %v4411_v23 }
 0x240   :  { %v546_v5 = vpop.f32.mrb[6].mxu0  ;;  %v617_v6 = vpop.f32.mrb[4].mxu1 }
 0x241   :  { %v622_v7 = vrot.slane %v546_v5, 6  ;;  %v548_v10 = vpop.f32.mrb[7].mxu0  ;;  %v3683_v11 = vpop.f32.mrb[5].mxu1  ;;  %v641_v22 = vadd.f32 %v4628_v55, %v617_v6 }
 0x242   :  { %v632_v15 = vrot.slane %v548_v10, 6 }
 0x243   :  { %v624_v13 = vadd.f32 %v622_v7, %v4619_v43  ;;  %v643_v25 = vrot.slane %v641_v22, 6 }
 0x244   :  { %v634_v16 = vadd.f32 %v632_v15, %v4622_v50 }
 0x245   :  { %v3496_v14 = vmul.f32 -1.442695, %v624_v13 }
 0x246   :  { %v3497_v21 = vmul.f32 -1.442695, %v634_v16 }
 0x247   :  { %4129 = vpow2.f32 %v3496_v14 }
 0x251   :  { %v4130_v17 = vpop.eup %4129 }
 0x252   :  { %v628_v19 = vadd.f32 1.0, %v4130_v17 }
 0x254   :  { %4131 = vrcp.f32 %v628_v19 }
 0x255   :  { %4133 = vpow2.f32 %v3497_v21 }
 0x25e   :  { %v4132_v28 = vpop.eup %4131 }
 0x25f   :  { %v645_v30 = vmul.f32 %v4132_v28, %v643_v25  ;;  %v4134_v33 = vpop.eup %4133 }
 0x260   :  { %v638_v34 = vadd.f32 1.0, %v4134_v33 }
 0x261   :  { %v646_v32 = vadd.f32 %v645_v30, %v4631_v59 }
 0x263   :  { %4135 = vtanh.f32 %v646_v32 }
 0x264   :  { %4137 = vrcp.f32 %v638_v34 }
 0x26d   :  { %v4136_v35 = vpop.eup %4135 }
 0x26e   :  { %v649_v36 = vrot.slane %v4136_v35, 2  ;;  %v4138_v41 = vpop.eup %4137 }
 0x270   :  { %v651_v37 = vsub.f32 %v4634_v4, %v649_v36 }
 0x272   :  { %v653_v39 = vrot.slane %v651_v37, 6 }
 0x274   :  { %v655_v44 = vmul.f32 %v4138_v41, %v653_v39 }
 0x276   :  { %v4656_v45 = vadd.f32 %v4136_v35, %v655_v44 }
 0x278   :  { %v658_v46 = vrot.slane %v4656_v45, 2 }
 0x27a   :  { %3498 = vmatmul.mubr.msk.f32.vlgmr.msra.gmra.mrb[8].mxu0 %vm305_vm3, %v658_v46  ;;  %3693 = vmatmul.mubr.msk.f32.vlgmr.msra.gmra.mrb[6].mxu1 %vm305_vm3, %v658_v46 }
 0x27b   :  { %3905 = vmatpush1.bf16.msra.mxu0 %v4552_v9  ;;  %3912 = vmatpush3.bf16.msra.mxu1 %v4564_v18 }
 0x27c   :  { %3907 = vmatprep.subr.bf16.mxu0 %v4555_v12  ;;  %3913 = vmatprep.subr.bf16.mxu1 %v4411_v23 }
 0x27d   :  { %906 = vmatprep.mubr.f32.mxu0 %v4410_v0  ;;  %3703 = vmatprep.mubr.msk.f32.mxu1 %vm4412_vm2, %v4410_v0 }
 0x27f   :  { %3909 = vmatpush1.bf16.msra.mxu0 %v4571_v20  ;;  %3915 = vmatpush3.bf16.msra.mxu1 %v4579_v24 }
 0x280   :  { %3917 = vmatprep.subr.bf16.mxu0 %v4550_v8  ;;  %3924 = vmatprep.subr.bf16.mxu1 %v4411_v23 }
 0x34d   :  { %v727_v47 = vpop.f32.mrb[8].mxu0  ;;  %v798_v48 = vpop.f32.mrb[6].mxu1 }
 0x34e   :  { %v803_v49 = vrot.slane %v727_v47, 4  ;;  %v729_v51 = vpop.f32.mrb[9].mxu0  ;;  %v3694_v52 = vpop.f32.mrb[7].mxu1  ;;  %v822_v62 = vadd.f32 %v4628_v55, %v798_v48 }
 0x34f   :  { %v813_v56 = vrot.slane %v729_v51, 4 }
 0x350   :  { %v805_v53 = vadd.f32 %v803_v49, %v4619_v43  ;;  %v824_v63 = vrot.slane %v822_v62, 4 }
 0x351   :  { %v815_v57 = vadd.f32 %v813_v56, %v4622_v50 }
 0x352   :  { %v3500_v54 = vmul.f32 -1.442695, %v805_v53 }
 0x353   :  { %v3501_v61 = vmul.f32 -1.442695, %v815_v57 }
 0x354   :  { %4139 = vpow2.f32 %v3500_v54 }
 0x35e   :  { %v4140_v58 = vpop.eup %4139 }
 0x35f   :  { %v809_v60 = vadd.f32 1.0, %v4140_v58 }
 0x361   :  { %4141 = vrcp.f32 %v809_v60 }
 0x362   :  { %4143 = vpow2.f32 %v3501_v61 }
 0x36b   :  { %v4142_v1 = vpop.eup %4141 }
 0x36c   :  { %v826_v2 = vmul.f32 %v4142_v1, %v824_v63  ;;  %v4144_v5 = vpop.eup %4143 }
 0x36d   :  { %v819_v6 = vadd.f32 1.0, %v4144_v5 }
 0x36e   :  { %v827_v3 = vadd.f32 %v826_v2, %v4631_v59 }
 0x370   :  { %4145 = vtanh.f32 %v827_v3 }
 0x371   :  { %4147 = vrcp.f32 %v819_v6 }
 0x37a   :  { %v4146_v7 = vpop.eup %4145 }
 0x37b   :  { %v830_v10 = vrot.slane %v4146_v7, 2  ;;  %v4148_v14 = vpop.eup %4147 }
 0x37d   :  { %v832_v11 = vsub.f32 %v4656_v45, %v830_v10 }
 0x37f   :  { %v834_v13 = vrot.slane %v832_v11, 6 }
 0x381   :  { %v836_v15 = vmul.f32 %v4148_v14, %v834_v13 }
 0x383   :  { %v4677_v16 = vadd.f32 %v4146_v7, %v836_v15 }
 0x385   :  { %v839_v17 = vrot.slane %v4677_v16, 4 }
 0x387   :  { %3502 = vmatmul.mubr.msk.f32.vlgmr.msra.gmra.mrb[10].mxu0 %vm305_vm3, %v839_v17  ;;  %3704 = vmatmul.mubr.msk.f32.vlgmr.msra.gmra.mrb[8].mxu1 %vm305_vm3, %v839_v17 }
 0x388   :  { %3919 = vmatpush1.bf16.msra.mxu0 %v4552_v9  ;;  %3926 = vmatpush3.bf16.msra.mxu1 %v4564_v18 }
 0x389   :  { %3921 = vmatprep.subr.bf16.mxu0 %v4555_v12  ;;  %3927 = vmatprep.subr.bf16.mxu1 %v4411_v23 }
 0x38a   :  { %1087 = vmatprep.mubr.f32.mxu0 %v4410_v0  ;;  %3714 = vmatprep.mubr.msk.f32.mxu1 %vm4412_vm2, %v4410_v0 }
 0x38c   :  { %3923 = vmatpush1.bf16.msra.mxu0 %v4571_v20  ;;  %3929 = vmatpush3.bf16.msra.mxu1 %v4579_v24 }
 0x38d   :  { %3931 = vmatprep.subr.bf16.mxu0 %v4550_v8  ;;  %3938 = vmatprep.subr.bf16.mxu1 %v4411_v23 }
 0x45a   :  { %v908_v19 = vpop.f32.mrb[10].mxu0  ;;  %v979_v21 = vpop.f32.mrb[8].mxu1 }
 0x45b   :  { %v984_v22 = vrot.slane %v908_v19, 2  ;;  %v910_v25 = vpop.f32.mrb[11].mxu0  ;;  %v3705_v28 = vpop.f32.mrb[9].mxu1  ;;  %v1003_v39 = vadd.f32 %v4628_v55, %v979_v21 }
 0x45c   :  { %v994_v33 = vrot.slane %v910_v25, 2 }
 0x45d   :  { %v986_v30 = vadd.f32 %v984_v22, %v4619_v43  ;;  %v1005_v41 = vrot.slane %v1003_v39, 2 }
 0x45e   :  { %v996_v34 = vadd.f32 %v994_v33, %v4622_v50 }
 0x45f   :  { %v3504_v32 = vmul.f32 -1.442695, %v986_v30 }
 0x460   :  { %v3505_v37 = vmul.f32 -1.442695, %v996_v34 }
 0x461   :  { %4149 = vpow2.f32 %v3504_v32 }
 0x46b   :  { %v4150_v35 = vpop.eup %4149 }
 0x46c   :  { %v990_v36 = vadd.f32 1.0, %v4150_v35 }
 0x46e   :  { %4151 = vrcp.f32 %v990_v36 }
 0x46f   :  { %4153 = vpow2.f32 %v3505_v37 }
 0x478   :  { %v4152_v44 = vpop.eup %4151 }
 0x479   :  { %v1007_v46 = vmul.f32 %v4152_v44, %v1005_v41  ;;  %v4154_v48 = vpop.eup %4153 }
 0x47a   :  { %v1000_v43 = vadd.f32 1.0, %v4154_v48 }
 0x47b   :  { %v1008_v47 = vadd.f32 %v1007_v46, %v4631_v59 }
 0x47d   :  { %4155 = vtanh.f32 %v1008_v47 }
 0x47e   :  { %4157 = vrcp.f32 %v1000_v43 }
 0x487   :  { %v4156_v49 = vpop.eup %4155 }
 0x488   :  { %v1011_v51 = vrot.slane %v4156_v49, 2  ;;  %v4158_v53 = vpop.eup %4157 }
 0x48a   :  { %v1013_v50 = vsub.f32 %v4677_v16, %v1011_v51 }
 0x48c   :  { %v1015_v52 = vrot.slane %v1013_v50, 6 }
 0x48e   :  { %v1017_v54 = vmul.f32 %v4158_v53, %v1015_v52 }
 0x490   :  { %v4698_v56 = vadd.f32 %v4156_v49, %v1017_v54 }
 0x492   :  { %v1020_v57 = vrot.slane %v4698_v56, 6 }
 0x494   :  { %3506 = vmatmul.mubr.msk.f32.vlgmr.msra.gmra.mrb[12].mxu0 %vm305_vm3, %v1020_v57  ;;  %3715 = vmatmul.mubr.msk.f32.vlgmr.msra.gmra.mrb[10].mxu1 %vm305_vm3, %v1020_v57 }
 0x495   :  { %3933 = vmatpush1.bf16.msra.mxu0 %v4552_v9  ;;  %3940 = vmatpush3.bf16.msra.mxu1 %v4564_v18 }
 0x496   :  { %3935 = vmatprep.subr.bf16.mxu0 %v4555_v12  ;;  %3941 = vmatprep.subr.bf16.mxu1 %v4411_v23 }
 0x497   :  { %1258 = vmatprep.mubr.f32.mxu0 %v4410_v0  ;;  %3725 = vmatprep.mubr.msk.f32.mxu1 %vm4412_vm2, %v4410_v0 }
 0x499   :  { %3937 = vmatpush1.bf16.msra.mxu0 %v4571_v20  ;;  %3943 = vmatpush3.bf16.msra.mxu1 %v4579_v24 }
 0x49a   :  { %3945 = vmatprep.subr.bf16.mxu0 %v4550_v8  ;;  %3952 = vmatprep.subr.bf16.mxu1 %v4411_v23 }
 0x567   :  { %v1089_v59 = vpop.f32.mrb[12].mxu0  ;;  %v1160_v58 = vpop.f32.mrb[10].mxu1 }
 0x568   :  { %v1164_v60 = vadd.f32 %v1089_v59, %v4615_v40  ;;  %v1091_v61 = vpop.f32.mrb[13].mxu0  ;;  %v3716_v62 = vpop.f32.mrb[11].mxu1  ;;  %v1178_v6 = vadd.f32 %v4628_v55, %v1160_v58 }
 0x569   :  { %v1171_v1 = vadd.f32 %v1091_v61, %v4617_v42 }
 0x56a   :  { %v3508_v63 = vmul.f32 -1.442695, %v1164_v60 }
 0x56b   :  { %v3509_v5 = vmul.f32 -1.442695, %v1171_v1  ;;  %v1745_v1 = vld [vmem:[#allocation6 + $0x20] sm:$0xff] }
 0x56c   :  { %4159 = vpow2.f32 %v3508_v63  ;;  %v1742_v63 = vld [vmem:[#allocation6 + $0x8] sm:$0xff] }
 0x576   :  { %v4160_v2 = vpop.eup %4159 }
 0x577   :  { %v1168_v3 = vadd.f32 1.0, %v4160_v2  ;;  %v3972_v2 = vpack.c.bf16 %v1745_v1, %v1742_v63  ;;  %v1931_v63 = vld [vmem:[#allocation7 + $0x18] sm:$0xff] }
 0x579   :  { %4161 = vrcp.f32 %v1168_v3 }
 0x57a   :  { %4163 = vpow2.f32 %v3509_v5 }
 0x583   :  { %v4162_v7 = vpop.eup %4161 }
 0x584   :  { %v1179_v10 = vmul.f32 %v4162_v7, %v1178_v6  ;;  %v4164_v13 = vpop.eup %4163 }
 0x585   :  { %v1175_v14 = vadd.f32 1.0, %v4164_v13 }
 0x586   :  { %v1180_v11 = vadd.f32 %v1179_v10, %v4613_v38 }
 0x588   :  { %4165 = vtanh.f32 %v1180_v11 }
 0x589   :  { %4167 = vrcp.f32 %v1175_v14 }
 0x592   :  { %v4166_v15 = vpop.eup %4165 }
 0x593   :  { %v1183_v17 = vrot.slane %v4166_v15, 2  ;;  %v4168_v22 = vpop.eup %4167 }
 0x595   :  { %v1185_v19 = vsub.f32 %v4698_v56, %v1183_v17 }
 0x597   :  { %v1187_v21 = vrot.slane %v1185_v19, 6 }
 0x599   :  { %v1189_v25 = vmul.f32 %v4168_v22, %v1187_v21 }
 0x59b   :  { %v4719_v28 = vadd.f32 %v4166_v15, %v1189_v25 }
 0x59d   :  { %3510 = vmatmul.mubr.msk.f32.vlgmr.msra.gmra.mrb[14].mxu0 %vm305_vm3, %v4719_v28  ;;  %3726 = vmatmul.mubr.msk.f32.vlgmr.msra.gmra.mrb[12].mxu1 %vm305_vm3, %v4719_v28 }
 0x59e   :  { %3947 = vmatpush1.bf16.msra.mxu0 %v4552_v9  ;;  %3954 = vmatpush3.bf16.msra.mxu1 %v4564_v18 }
 0x59f   :  { %3949 = vmatprep.subr.bf16.mxu0 %v4555_v12  ;;  %3955 = vmatprep.subr.bf16.mxu1 %v4411_v23 }
 0x5a0   :  { %1439 = vmatprep.mubr.f32.mxu0 %v4410_v0  ;;  %3736 = vmatprep.mubr.msk.f32.mxu1 %vm4412_vm2, %v4410_v0 }
 0x5a2   :  { %3951 = vmatpush1.bf16.msra.mxu0 %v4571_v20  ;;  %3957 = vmatpush3.bf16.msra.mxu1 %v4579_v24 }
 0x5a3   :  { %3959 = vmatprep.subr.bf16.mxu0 %v4550_v8  ;;  %3966 = vmatprep.subr.bf16.mxu1 %v4411_v23 }
 0x670   :  { %v1260_v30 = vpop.f32.mrb[14].mxu0  ;;  %v1331_v32 = vpop.f32.mrb[12].mxu1 }
 0x671   :  { %v1336_v33 = vrot.slane %v1260_v30, 6  ;;  %v1262_v34 = vpop.f32.mrb[15].mxu0  ;;  %v3727_v35 = vpop.f32.mrb[13].mxu1  ;;  %v1355_v8 = vadd.f32 %v4628_v55, %v1331_v32 }
 0x672   :  { %v1346_v39 = vrot.slane %v1262_v34, 6 }
 0x673   :  { %v1338_v36 = vadd.f32 %v1336_v33, %v4615_v40  ;;  %v1357_v48 = vrot.slane %v1355_v8, 6 }
 0x674   :  { %v1348_v41 = vadd.f32 %v1346_v39, %v4617_v42  ;;  %v1744_v39 = vld [vmem:[#allocation6 + $0x18] sm:$0xff] }
 0x675   :  { %v3512_v37 = vmul.f32 -1.442695, %v1338_v36 }
 0x676   :  { %v3513_v47 = vmul.f32 -1.442695, %v1348_v41  ;;  %v1748_v41 = vld [vmem:[#allocation6 + $0x38] sm:$0xff] }
 0x677   :  { %4169 = vpow2.f32 %v3512_v37  ;;  %v1741_v37 = vld [vmem:[#allocation6] sm:$0xff] }
 0x681   :  { %v4170_v44 = vpop.eup %4169 }
 0x682   :  { %v1342_v46 = vadd.f32 1.0, %v4170_v44  ;;  %v1751_v44 = vld [vmem:[#allocation6 + $0x50] sm:$0xff] }
 0x684   :  { %4171 = vrcp.f32 %v1342_v46 }
 0x685   :  { %4173 = vpow2.f32 %v3513_v47  ;;  %v3974_v47 = vpack.c.bf16 %v1744_v39, %v1741_v37 }
 0x68e   :  { %v4172_v43 = vpop.eup %4171 }
 0x68f   :  { %v1359_v49 = vmul.f32 %v4172_v43, %v1357_v48  ;;  %v4174_v50 = vpop.eup %4173  ;;  %v1734_v48 = vsel %vm1733_vm4, %v4634_v4, %v4656_v45  ;;  %v3976_v43 = vpack.c.bf16 %v1751_v44, %v1748_v41  ;;  %v1743_v4 = vld [vmem:[#allocation6 + $0x10] sm:$0xff]  ;;  %v1746_v45 = vld [vmem:[#allocation6 + $0x28] sm:$0xff] }
 0x690   :  { %v1352_v52 = vadd.f32 1.0, %v4174_v50  ;;  %v1735_v50 = vsel %vm133_vm0, %v1734_v48, %v4677_v16  ;;  %v1749_v16 = vld [vmem:[#allocation6 + $0x40] sm:$0xff] }
 0x691   :  { %v1360_v51 = vadd.f32 %v1359_v49, %v4613_v38  ;;  %v1747_v49 = vld [vmem:[#allocation6 + $0x30] sm:$0xff] }
 0x693   :  { %4175 = vtanh.f32 %v1360_v51  ;;  %v1750_v51 = vld [vmem:[#allocation6 + $0x48] sm:$0xff] }
 0x694   :  { %4177 = vrcp.f32 %v1352_v52  ;;  %v1737_v52 = vsel %vm1736_vm5, %v1735_v50, %v4698_v56  ;;  %v1939_v50 = vld [vmem:[#allocation7 + $0x58] sm:$0xff] }
 0x69d   :  { %v4176_v53 = vpop.eup %4175 }
 0x69e   :  { %v1363_v54 = vrot.slane %v4176_v53, 2  ;;  %v4178_v58 = vpop.eup %4177 }
 0x6a0   :  { %v1365_v57 = vsub.f32 %v4719_v28, %v1363_v54  ;;  %v3980_v54 = vpack.c.bf16 %v1746_v45, %v1743_v4 }
 0x6a2   :  { %v1367_v59 = vrot.slane %v1365_v57, 6  ;;  %v1752_v57 = vld [vmem:[#allocation6 + $0x58] sm:$0xff] }
 0x6a3   :  { %v3984_v56 = vpack.c.bf16 %v1752_v57, %v1749_v16 }
 0x6a4   :  { %v1369_v60 = vmul.f32 %v4178_v58, %v1367_v59  ;;  %v1929_v59 = vld [vmem:[#allocation7 + $0x8] sm:$0xff]  ;;  %v1932_v58 = vld [vmem:[#allocation7 + $0x20] sm:$0xff] }
 0x6a6   :  { %v4741_v61 = vadd.f32 %v4176_v53, %v1369_v60  ;;  %v3978_v53 = vpack.c.bf16 %v1750_v51, %v1747_v49  ;;  %v4776_v60 = vpack.c.bf16 %v1932_v58, %v1929_v59  ;;  %v1936_v51 = vld [vmem:[#allocation7 + $0x40] sm:$0xff] }
 0x6a8   :  { %v1372_v62 = vrot.slane %v4741_v61, 2 }
 0x6aa   :  { %3514 = vmatmul.mubr.msk.f32.vlgmr.msra.gmra.mrb[16].mxu0 %vm305_vm3, %v1372_v62  ;;  %3737 = vmatmul.mubr.msk.f32.vlgmr.msra.gmra.mrb[14].mxu1 %vm305_vm3, %v1372_v62  ;;  %v1928_v62 = vld [vmem:[#allocation7] sm:$0xff] }
 0x6ab   :  { %3961 = vmatpush1.bf16.msra.mxu0 %v4552_v9  ;;  %3968 = vmatpush3.bf16.msra.mxu1 %v4564_v18  ;;  %v4778_v1 = vpack.c.bf16 %v1931_v63, %v1928_v62 }
 0x6ac   :  { %3963 = vmatprep.subr.bf16.mxu0 %v4555_v12  ;;  %3969 = vmatprep.subr.bf16.mxu1 %v4411_v23 }
 0x6ad   :  { %1620 = vmatprep.mubr.f32.mxu0 %v4410_v0  ;;  %3747 = vmatprep.mubr.msk.f32.mxu1 %vm4412_vm2, %v4410_v0 }
 0x6af   :  { %3965 = vmatpush1.bf16.msra.mxu0 %v4571_v20  ;;  %3971 = vmatpush3.bf16.msra.mxu1 %v4579_v24 }
 0x6b0   :  { %3973 = vmatprep.subr.bf16.mxu0 %v3972_v2  ;;  %3981 = vmatprep.subr.bf16.mxu1 %v3980_v54  ;;  %v1935_v2 = vld [vmem:[#allocation7 + $0x38] sm:$0xff] }
 0x77d   :  { %v1441_v9 = vpop.f32.mrb[16].mxu0  ;;  %v1512_v3 = vpop.f32.mrb[14].mxu1 }
 0x77e   :  { %v1517_v18 = vrot.slane %v1441_v9, 4  ;;  %v1443_v5 = vpop.f32.mrb[17].mxu0  ;;  %v3738_v12 = vpop.f32.mrb[15].mxu1  ;;  %v1536_v14 = vadd.f32 %v4628_v55, %v1512_v3  ;;  %v1938_v9 = vld [vmem:[#allocation7 + $0x50] sm:$0xff] }
 0x77f   :  { %v1527_v10 = vrot.slane %v1443_v5, 4  ;;  %v4783_v3 = vpack.c.bf16 %v1938_v9, %v1935_v2  ;;  %v1937_v5 = vld [vmem:[#allocation7 + $0x48] sm:$0xff] }
 0x780   :  { %v1519_v6 = vadd.f32 %v1517_v18, %v4615_v40  ;;  %v1538_v15 = vrot.slane %v1536_v14, 4  ;;  %v1934_v18 = vld [vmem:[#allocation7 + $0x30] sm:$0xff] }
 0x781   :  { %v1529_v11 = vadd.f32 %v1527_v10, %v4617_v42  ;;  %v4785_v12 = vpack.c.bf16 %v1937_v5, %v1934_v18 }
 0x782   :  { %v3516_v7 = vmul.f32 -1.442695, %v1519_v6 }
 0x783   :  { %v3517_v24 = vmul.f32 -1.442695, %v1529_v11 }
 0x784   :  { %4179 = vpow2.f32 %v3516_v7 }
 0x78e   :  { %v4180_v13 = vpop.eup %4179 }
 0x78f   :  { %v1523_v20 = vadd.f32 1.0, %v4180_v13 }
 0x791   :  { %4181 = vrcp.f32 %v1523_v20 }
 0x792   :  { %4183 = vpow2.f32 %v3517_v24 }
 0x79b   :  { %v4182_v17 = vpop.eup %4181 }
 0x79c   :  { %v1540_v19 = vmul.f32 %v4182_v17, %v1538_v15  ;;  %v4184_v22 = vpop.eup %4183 }
 0x79d   :  { %v1533_v25 = vadd.f32 1.0, %v4184_v22 }
 0x79e   :  { %v1541_v21 = vadd.f32 %v1540_v19, %v4613_v38 }
 0x7a0   :  { %4185 = vtanh.f32 %v1541_v21 }
 0x7a1   :  { %4187 = vrcp.f32 %v1533_v25 }
 0x7aa   :  { %v4186_v30 = vpop.eup %4185 }
 0x7ab   :  { %v1544_v32 = vrot.slane %v4186_v30, 2  ;;  %v4188_v35 = vpop.eup %4187 }
 0x7ad   :  { %v1546_v33 = vsub.f32 %v4741_v61, %v1544_v32 }
 0x7af   :  { %v1548_v34 = vrot.slane %v1546_v33, 6 }
 0x7b1   :  { %v1550_v36 = vmul.f32 %v4188_v35, %v1548_v34 }
 0x7b3   :  { %v4760_v46 = vadd.f32 %v4186_v30, %v1550_v36 }
 0x7b5   :  { %v1553_v8 = vrot.slane %v4760_v46, 4 }
 0x7b7   :  { %3518 = vmatmul.mubr.msk.f32.vlgmr.msra.gmra.mrb[18].mxu0 %vm305_vm3, %v1553_v8  ;;  %3748 = vmatmul.mubr.msk.f32.vlgmr.msra.gmra.mrb[16].mxu1 %vm305_vm3, %v1553_v8  ;;  %v1933_v8 = vld [vmem:[#allocation7 + $0x28] sm:$0xff] }
 0x7b8   :  { %3975 = vmatpush1.bf16.msra.mxu0 %v3974_v47  ;;  %3758 = vmatprep.mubr.msk.f32.mxu1 %vm305_vm3, %v1737_v52  ;;  %v1930_v47 = vld [vmem:[#allocation7 + $0x10] sm:$0xff] }
 0x7b9   :  { %3977 = vmatprep.subr.bf16.mxu0 %v3976_v43  ;;  %1840 = vmatprep.mubr.f32.mxu0 %v4410_v0  ;;  %v4800_v49 = vpack.c.bf16 %v1933_v8, %v1930_v47 }
 0x7ba   :  { %3983 = vmatpush3.bf16.msra.mxu1 %v3980_v54 }
 0x7bb   :  { %3985 = vmatprep.subr.bf16.mxu1 %v3984_v56 }
 0x7bc   :  { %3979 = vmatpush1.bf16.msra.mxu0 %v3978_v53  ;;  %v4809_v53 = vpack.c.bf16 %v1939_v50, %v1936_v51 }
 0x7bd   :  { %3989 = vmatprep.subr.bf16.mxu0 %v4776_v60 }
 0x7be   :  { %3987 = vmatpush3.bf16.msra.mxu1 %v3984_v56 }
 0x7bf   :  { %3522 = vmatmul.mubr.msk.f32.vlgmr.msra.gmra.mrb[20].mxu0 %vm305_vm3, %v1737_v52  ;;  %3996 = vmatprep.subr.bf16.mxu1 %v4411_v23 }
 0x7c0   :  { %1846 = vmatprep.mubr.f32.mxu0 %v4410_v0  ;;  %3991 = vmatpush1.bf16.msra.mxu0 %v4778_v1 }
 0x7c1   :  { %3993 = vmatprep.subr.bf16.mxu0 %v4783_v3 }
 0x7c4   :  { %3995 = vmatpush1.bf16.msra.mxu0 %v4785_v12 }
 0x7c5   :  { %4003 = vmatprep.subr.bf16.mxu0 %v4776_v60 }
 0x88a   :  { %v1622_v6 = vpop.f32.mrb[18].mxu0  ;;  %v1693_v7 = vpop.f32.mrb[16].mxu1 }
 0x88b   :  { %v1698_v10 = vrot.slane %v1622_v6, 2  ;;  %v1624_v11 = vpop.f32.mrb[19].mxu0  ;;  %v3749_v13 = vpop.f32.mrb[17].mxu1  ;;  %v1717_v30 = vadd.f32 %v4628_v55, %v1693_v7  ;;  %v1738_v55 = vsel %vm1733_vm4, %v4719_v28, %v4741_v61  ;;  %v1753_v28 = vld [vmem:[%s5047_s7] sm:$0x7] }
 0x88c   :  { %v1708_v17 = vrot.slane %v1624_v11, 2  ;;  %v1766_v61 = vrot.slane %v1753_v28, %v118_v27  ;;  %v4850_v27 = vrot.slane %v1753_v28, %v114_v31 }
 0x88d   :  { %v1700_v20 = vadd.f32 %v1698_v10, %v4615_v40  ;;  %v1719_v32 = vrot.slane %v1717_v30, 2 }
 0x88e   :  { %v1710_v19 = vadd.f32 %v1708_v17, %v4617_v42 }
 0x88f   :  { %v3520_v24 = vmul.f32 -1.442695, %v1700_v20 }
 0x890   :  { %v3521_v25 = vmul.f32 -1.442695, %v1710_v19 }
 0x891   :  { %4189 = vpow2.f32 %v3520_v24 }
 0x892   :  { %v1842_v14 = vpop.f32.mrb[20].mxu0 }
 0x893   :  { %v4791_v15 = vpop.f32.mrb[21].mxu0 }
 0x894   :  { %v4854_v9 = vadd.f32 %v4791_v15, %v4850_v27 }
 0x89b   :  { %v4190_v21 = vpop.eup %4189 }
 0x89c   :  { %v1704_v22 = vadd.f32 1.0, %v4190_v21 }
 0x89e   :  { %4191 = vrcp.f32 %v1704_v22 }
 0x89f   :  { %4193 = vpow2.f32 %v3521_v25 }
 0x8a8   :  { %v4192_v33 = vpop.eup %4191 }
 0x8a9   :  { %v1721_v34 = vmul.f32 %v4192_v33, %v1719_v32  ;;  %v4194_v35 = vpop.eup %4193 }
 0x8aa   :  { %v1714_v36 = vadd.f32 1.0, %v4194_v35 }
 0x8ab   :  { %v1722_v40 = vadd.f32 %v1721_v34, %v4613_v38  ;;  %v1739_v38 = vsel %vm133_vm0, %v1738_v55, %v4760_v46 }
 0x8ad   :  { %4195 = vtanh.f32 %v1722_v40 }
 0x8ae   :  { %4197 = vrcp.f32 %v1714_v36 }
 0x8b7   :  { %v4196_v37 = vpop.eup %4195 }
 0x8b8   :  { %v1725_v39 = vrot.slane %v4196_v37, 2  ;;  %v4198_v44 = vpop.eup %4197 }
 0x8ba   :  { %v1727_v42 = vsub.f32 %v4760_v46, %v1725_v39  ;;  %v4836_v46 = vrot.slane %v1753_v28, %v110_v29 }
 0x8bc   :  { %v1729_v41 = vrot.slane %v1727_v42, 6  ;;  %v4845_v59 = vadd.f32 %v1842_v14, %v4836_v46 }
 0x8be   :  { %v1731_v48 = vmul.f32 %v4198_v44, %v1729_v41 }
 0x8c0   :  { %v1732_v43 = vadd.f32 %v4196_v37, %v1731_v48 }
 0x8c2   :  { %v1740_v52 = vsel %vm1736_vm5, %v1739_v38, %v1732_v43 }
 0x8c3   :  { %3523 = vmatmul.mubr.msk.f32.gmra.mrb[22].mxu0 %vm305_vm3, %v1740_v52  ;;  %3759 = vmatmul.mubr.msk.f32.vlgmr.msra.gmra.mrb[18].mxu1 %vm305_vm3, %v1740_v52 }
 0x8c4   :  { %2005 = vmatprep.mubr.f32.mxu0 %v4410_v0  ;;  %3998 = vmatpush3.bf16.msra.mxu1 %v4800_v49 }
 0x8c5   :  { %3999 = vmatprep.subr.bf16.mxu1 %v4411_v23  ;;  %3769 = vmatprep.mubr.msk.f32.mxu1 %vm4412_vm2, %v4410_v0 }
 0x8c7   :  { %2006 = vmatmul.mubr.f32.vlgmr.msra.gmra.mrb[24].mxu0 %v4410_v0 }
 0x8c8   :  { %4001 = vmatpush3.bf16.msra.mxu1 %v4809_v53  ;;  %4005 = vmatpush1.bf16.msra.mxu0 %v4778_v1 }
 0x8c9   :  { %4010 = vmatprep.subr.bf16.mxu1 %v4411_v23  ;;  %4007 = vmatprep.subr.bf16.mxu0 %v4783_v3 }
 0x8ca   :  { %2176 = vmatprep.mubr.f32.mxu0 %v4410_v0 }
 0x8cb   :  { %3770 = vmatmul.mubr.f32.vlgmr.msra.gmra.mrb[20].mxu1 %v4410_v0 }
 0x8cc   :  { %4012 = vmatpush3.bf16.msra.mxu1 %v4800_v49  ;;  %4009 = vmatpush1.bf16.msra.mxu0 %v4785_v12 }
 0x8cd   :  { %4013 = vmatprep.subr.bf16.mxu1 %v4411_v23  ;;  %3780 = vmatprep.mubr.msk.f32.mxu1 %vm4412_vm2, %v4410_v0 }
 0x8ce   :  { %4017 = vmatprep.subr.bf16.mxu0 %v4776_v60 }
 0x8d0   :  { %4015 = vmatpush3.bf16.msra.mxu1 %v4809_v53 }
 0x8d1   :  { %4024 = vmatprep.subr.bf16.mxu1 %v4411_v23 }
 0x996   :  { %v4838_v4 = vpop.f32.mrb[22].mxu0  ;;  %v3760_v45 = vpop.f32.mrb[18].mxu1 }
 0x997   :  { %v4840_v16 = vadd.f32 %v3760_v45, %v1766_v61  ;;  %v4842_v54 = vpop.f32.mrb[23].mxu0  ;;  %v1919_v57 = vpop.f32.mrb[19].mxu1 }
 0x998   :  { %v4863_v13 = vadd.f32 %v1919_v57, %v1766_v61 }
 0x99a   :  { %v2007_v58 = vpop.f32.mrb[24].mxu0 }
 0x99b   :  { %v2082_v56 = vadd.f32 %v2007_v58, %v4845_v59  ;;  %v2009_v62 = vpop.f32.mrb[25].mxu0 }
 0x99c   :  { %v2089_v18 = vadd.f32 %v2009_v62, %v4854_v9 }
 0x99d   :  { %v3526_v29 = vmul.f32 -1.442695, %v2082_v56 }
 0x99e   :  { %v2078_v63 = vpop.f32.mrb[20].mxu1  ;;  %v3527_v5 = vmul.f32 -1.442695, %v2089_v18 }
 0x99f   :  { %4199 = vpow2.f32 %v3526_v29  ;;  %v3771_v2 = vpop.f32.mrb[21].mxu1  ;;  %v2102_v31 = vadd.f32 %v4860_v26, %v2078_v63 }
 0x9a0   :  { %4201 = vpow2.f32 %v3527_v5 }
 0x9a9   :  { %v4200_v6 = vpop.eup %4199 }
 0x9aa   :  { %v2086_v7 = vadd.f32 1.0, %v4200_v6  ;;  %v4202_v10 = vpop.eup %4201 }
 0x9ab   :  { %v2093_v24 = vadd.f32 1.0, %v4202_v10 }
 0x9ac   :  { %4203 = vrcp.f32 %v2086_v7 }
 0x9b6   :  { %v4204_v11 = vpop.eup %4203 }
 0x9b7   :  { %v2103_v20 = vmul.f32 %v4204_v11, %v2102_v31 }
 0x9b9   :  { %v2104_v14 = vadd.f32 %v2103_v20, %v4863_v13 }
 0x9bb   :  { %4205 = vtanh.f32 %v2104_v14 }
 0x9bc   :  { %4207 = vrcp.f32 %v2093_v24 }
 0x9c5   :  { %v4206_v15 = vpop.eup %4205 }
 0x9c6   :  { %v2106_v17 = vsub.f32 0.0, %v4206_v15  ;;  %v4208_v19 = vpop.eup %4207 }
 0x9c8   :  { %v2107_v21 = vmul.f32 %v4208_v19, %v2106_v17 }
 0x9ca   :  { %v4866_v22 = vadd.f32 %v4206_v15, %v2107_v21 }
 0x9cc   :  { %3529 = vmatmul.mubr.msk.f32.vlgmr.msra.gmra.mrb[26].mxu0 %vm305_vm3, %v4866_v22  ;;  %3781 = vmatmul.mubr.msk.f32.vlgmr.msra.gmra.mrb[22].mxu1 %vm305_vm3, %v4866_v22 }
 0x9cd   :  { %4019 = vmatpush1.bf16.msra.mxu0 %v4778_v1  ;;  %4026 = vmatpush3.bf16.msra.mxu1 %v4800_v49 }
 0x9ce   :  { %4021 = vmatprep.subr.bf16.mxu0 %v4783_v3  ;;  %4027 = vmatprep.subr.bf16.mxu1 %v4411_v23 }
 0x9cf   :  { %2357 = vmatprep.mubr.f32.mxu0 %v4410_v0  ;;  %3791 = vmatprep.mubr.msk.f32.mxu1 %vm4412_vm2, %v4410_v0 }
 0x9d1   :  { %4023 = vmatpush1.bf16.msra.mxu0 %v4785_v12  ;;  %4029 = vmatpush3.bf16.msra.mxu1 %v4809_v53 }
 0x9d2   :  { %4031 = vmatprep.subr.bf16.mxu0 %v4776_v60  ;;  %4038 = vmatprep.subr.bf16.mxu1 %v4411_v23 }
 0xa9f   :  { %v2178_v25 = vpop.f32.mrb[26].mxu0  ;;  %v2249_v30 = vpop.f32.mrb[22].mxu1 }
 0xaa0   :  { %v2254_v32 = vrot.slane %v2178_v25, 6  ;;  %v2180_v33 = vpop.f32.mrb[27].mxu0  ;;  %v3782_v34 = vpop.f32.mrb[23].mxu1  ;;  %v2273_v44 = vadd.f32 %v4860_v26, %v2249_v30 }
 0xaa1   :  { %v2264_v36 = vrot.slane %v2180_v33, 6 }
 0xaa2   :  { %v2256_v40 = vadd.f32 %v2254_v32, %v4845_v59  ;;  %v2275_v47 = vrot.slane %v2273_v44, 6 }
 0xaa3   :  { %v2266_v37 = vadd.f32 %v2264_v36, %v4854_v9 }
 0xaa4   :  { %v3531_v35 = vmul.f32 -1.442695, %v2256_v40 }
 0xaa5   :  { %v3532_v41 = vmul.f32 -1.442695, %v2266_v37 }
 0xaa6   :  { %4209 = vpow2.f32 %v3531_v35 }
 0xab0   :  { %v4210_v39 = vpop.eup %4209 }
 0xab1   :  { %v2260_v42 = vadd.f32 1.0, %v4210_v39 }
 0xab3   :  { %4211 = vrcp.f32 %v2260_v42 }
 0xab4   :  { %4213 = vpow2.f32 %v3532_v41 }
 0xabd   :  { %v4212_v8 = vpop.eup %4211 }
 0xabe   :  { %v2277_v48 = vmul.f32 %v4212_v8, %v2275_v47  ;;  %v4214_v55 = vpop.eup %4213 }
 0xabf   :  { %v2270_v38 = vadd.f32 1.0, %v4214_v55 }
 0xac0   :  { %v2278_v43 = vadd.f32 %v2277_v48, %v4863_v13 }
 0xac2   :  { %4215 = vtanh.f32 %v2278_v43 }
 0xac3   :  { %4217 = vrcp.f32 %v2270_v38 }
 0xacc   :  { %v4216_v51 = vpop.eup %4215 }
 0xacd   :  { %v2281_v50 = vrot.slane %v4216_v51, 2  ;;  %v4218_v61 = vpop.eup %4217 }
 0xacf   :  { %v2283_v52 = vsub.f32 %v4866_v22, %v2281_v50 }
 0xad1   :  { %v2285_v28 = vrot.slane %v2283_v52, 6 }
 0xad3   :  { %v2287_v45 = vmul.f32 %v4218_v61, %v2285_v28 }
 0xad5   :  { %v4888_v57 = vadd.f32 %v4216_v51, %v2287_v45 }
 0xad7   :  { %v2290_v58 = vrot.slane %v4888_v57, 2 }
 0xad9   :  { %3533 = vmatmul.mubr.msk.f32.vlgmr.msra.gmra.mrb[28].mxu0 %vm305_vm3, %v2290_v58  ;;  %3792 = vmatmul.mubr.msk.f32.vlgmr.msra.gmra.mrb[24].mxu1 %vm305_vm3, %v2290_v58 }
 0xada   :  { %4033 = vmatpush1.bf16.msra.mxu0 %v4778_v1  ;;  %4040 = vmatpush3.bf16.msra.mxu1 %v4800_v49 }
 0xadb   :  { %4035 = vmatprep.subr.bf16.mxu0 %v4783_v3  ;;  %4041 = vmatprep.subr.bf16.mxu1 %v4411_v23 }
 0xadc   :  { %2538 = vmatprep.mubr.f32.mxu0 %v4410_v0  ;;  %3802 = vmatprep.mubr.msk.f32.mxu1 %vm4412_vm2, %v4410_v0 }
 0xade   :  { %4037 = vmatpush1.bf16.msra.mxu0 %v4785_v12  ;;  %4043 = vmatpush3.bf16.msra.mxu1 %v4809_v53 }
 0xadf   :  { %4045 = vmatprep.subr.bf16.mxu0 %v4776_v60  ;;  %4052 = vmatprep.subr.bf16.mxu1 %v4411_v23 }
 0xbac   :  { %v2359_v56 = vpop.f32.mrb[28].mxu0  ;;  %v2430_v62 = vpop.f32.mrb[24].mxu1 }
 0xbad   :  { %v2435_v29 = vrot.slane %v2359_v56, 4  ;;  %v2361_v63 = vpop.f32.mrb[29].mxu0  ;;  %v3793_v2 = vpop.f32.mrb[25].mxu1  ;;  %v2454_v20 = vadd.f32 %v4860_v26, %v2430_v62 }
 0xbae   :  { %v2445_v6 = vrot.slane %v2361_v63, 4 }
 0xbaf   :  { %v2437_v18 = vadd.f32 %v2435_v29, %v4845_v59  ;;  %v2456_v24 = vrot.slane %v2454_v20, 4 }
 0xbb0   :  { %v2447_v7 = vadd.f32 %v2445_v6, %v4854_v9 }
 0xbb1   :  { %v3535_v5 = vmul.f32 -1.442695, %v2437_v18 }
 0xbb2   :  { %v3536_v11 = vmul.f32 -1.442695, %v2447_v7 }
 0xbb3   :  { %4219 = vpow2.f32 %v3535_v5 }
 0xbbd   :  { %v4220_v31 = vpop.eup %4219 }
 0xbbe   :  { %v2441_v10 = vadd.f32 1.0, %v4220_v31 }
 0xbc0   :  { %4221 = vrcp.f32 %v2441_v10 }
 0xbc1   :  { %4223 = vpow2.f32 %v3536_v11 }
 0xbca   :  { %v4222_v14 = vpop.eup %4221 }
 0xbcb   :  { %v2458_v15 = vmul.f32 %v4222_v14, %v2456_v24  ;;  %v4224_v19 = vpop.eup %4223  ;;  %v4953_v24 = vadd.f32 %v4842_v54, %v4850_v27 }
 0xbcc   :  { %v2451_v21 = vadd.f32 1.0, %v4224_v19 }
 0xbcd   :  { %v2459_v17 = vadd.f32 %v2458_v15, %v4863_v13 }
 0xbcf   :  { %4225 = vtanh.f32 %v2459_v17 }
 0xbd0   :  { %4227 = vrcp.f32 %v2451_v21 }
 0xbd9   :  { %v4226_v25 = vpop.eup %4225 }
 0xbda   :  { %v2462_v30 = vrot.slane %v4226_v25, 2  ;;  %v4228_v34 = vpop.eup %4227 }
 0xbdc   :  { %v2464_v32 = vsub.f32 %v4888_v57, %v2462_v30 }
 0xbde   :  { %v2466_v33 = vrot.slane %v2464_v32, 6 }
 0xbe0   :  { %v2468_v40 = vmul.f32 %v4228_v34, %v2466_v33 }
 0xbe2   :  { %v4909_v35 = vadd.f32 %v4226_v25, %v2468_v40 }
 0xbe4   :  { %v2471_v36 = vrot.slane %v4909_v35, 4 }
 0xbe6   :  { %3537 = vmatmul.mubr.msk.f32.vlgmr.msra.gmra.mrb[30].mxu0 %vm305_vm3, %v2471_v36  ;;  %3803 = vmatmul.mubr.msk.f32.vlgmr.msra.gmra.mrb[26].mxu1 %vm305_vm3, %v2471_v36 }
 0xbe7   :  { %4047 = vmatpush1.bf16.msra.mxu0 %v4778_v1  ;;  %4054 = vmatpush3.bf16.msra.mxu1 %v4800_v49 }
 0xbe8   :  { %4049 = vmatprep.subr.bf16.mxu0 %v4783_v3  ;;  %4055 = vmatprep.subr.bf16.mxu1 %v4411_v23 }
 0xbe9   :  { %2719 = vmatprep.mubr.f32.mxu0 %v4410_v0  ;;  %3813 = vmatprep.mubr.msk.f32.mxu1 %vm4412_vm2, %v4410_v0 }
 0xbeb   :  { %4051 = vmatpush1.bf16.msra.mxu0 %v4785_v12  ;;  %4057 = vmatpush3.bf16.msra.mxu1 %v4809_v53 }
 0xbec   :  { %4059 = vmatprep.subr.bf16.mxu0 %v4776_v60  ;;  %4066 = vmatprep.subr.bf16.mxu1 %v4411_v23 }
 0xcb9   :  { %v2540_v37 = vpop.f32.mrb[30].mxu0  ;;  %v2611_v39 = vpop.f32.mrb[26].mxu1 }
 0xcba   :  { %v2616_v42 = vrot.slane %v2540_v37, 2  ;;  %v2542_v41 = vpop.f32.mrb[31].mxu0  ;;  %v3804_v44 = vpop.f32.mrb[27].mxu1  ;;  %v2635_v50 = vadd.f32 %v4860_v26, %v2611_v39 }
 0xcbb   :  { %v2626_v48 = vrot.slane %v2542_v41, 2 }
 0xcbc   :  { %v2618_v47 = vadd.f32 %v2616_v42, %v4845_v59  ;;  %v2637_v52 = vrot.slane %v2635_v50, 2 }
 0xcbd   :  { %v2628_v43 = vadd.f32 %v2626_v48, %v4854_v9 }
 0xcbe   :  { %v3539_v8 = vmul.f32 -1.442695, %v2618_v47 }
 0xcbf   :  { %v3540_v51 = vmul.f32 -1.442695, %v2628_v43 }
 0xcc0   :  { %4229 = vpow2.f32 %v3539_v8 }
 0xcca   :  { %v4230_v55 = vpop.eup %4229 }
 0xccb   :  { %v2622_v38 = vadd.f32 1.0, %v4230_v55 }
 0xccd   :  { %4231 = vrcp.f32 %v2622_v38 }
 0xcce   :  { %4233 = vpow2.f32 %v3540_v51 }
 0xcd7   :  { %v4232_v28 = vpop.eup %4231 }
 0xcd8   :  { %v2639_v61 = vmul.f32 %v4232_v28, %v2637_v52  ;;  %v4234_v58 = vpop.eup %4233 }
 0xcd9   :  { %v2632_v59 = vadd.f32 1.0, %v4234_v58 }
 0xcda   :  { %v2640_v45 = vadd.f32 %v2639_v61, %v4863_v13  ;;  %v4948_v13 = vadd.f32 %v4838_v4, %v4836_v46 }
 0xcdc   :  { %4235 = vtanh.f32 %v2640_v45 }
 0xcdd   :  { %4237 = vrcp.f32 %v2632_v59 }
 0xce6   :  { %v4236_v56 = vpop.eup %4235 }
 0xce7   :  { %v2643_v62 = vrot.slane %v4236_v56, 2  ;;  %v4238_v63 = vpop.eup %4237 }
 0xce9   :  { %v2645_v9 = vsub.f32 %v4909_v35, %v2643_v62 }
 0xceb   :  { %v2647_v29 = vrot.slane %v2645_v9, 6 }
 0xced   :  { %v2649_v2 = vmul.f32 %v4238_v63, %v2647_v29 }
 0xcef   :  { %v4930_v18 = vadd.f32 %v4236_v56, %v2649_v2 }
 0xcf1   :  { %v2652_v5 = vrot.slane %v4930_v18, 6 }
 0xcf3   :  { %3541 = vmatmul.mubr.msk.f32.vlgmr.msra.gmra.mrb[32].mxu0 %vm305_vm3, %v2652_v5  ;;  %3814 = vmatmul.mubr.msk.f32.vlgmr.msra.gmra.mrb[28].mxu1 %vm305_vm3, %v2652_v5 }
 0xcf4   :  { %4061 = vmatpush1.bf16.msra.mxu0 %v4778_v1  ;;  %4068 = vmatpush3.bf16.msra.mxu1 %v4800_v49 }
 0xcf5   :  { %4063 = vmatprep.subr.bf16.mxu0 %v4783_v3  ;;  %4069 = vmatprep.subr.bf16.mxu1 %v4411_v23 }
 0xcf6   :  { %2890 = vmatprep.mubr.f32.mxu0 %v4410_v0  ;;  %3824 = vmatprep.mubr.msk.f32.mxu1 %vm4412_vm2, %v4410_v0 }
 0xcf8   :  { %4065 = vmatpush1.bf16.msra.mxu0 %v4785_v12  ;;  %4071 = vmatpush3.bf16.msra.mxu1 %v4809_v53 }
 0xcf9   :  { %4073 = vmatprep.subr.bf16.mxu0 %v4776_v60  ;;  %4080 = vmatprep.subr.bf16.mxu1 %v4411_v23 }
 0xdc6   :  { %v2721_v6 = vpop.f32.mrb[32].mxu0  ;;  %v2792_v7 = vpop.f32.mrb[28].mxu1 }
 0xdc7   :  { %v2796_v31 = vadd.f32 %v2721_v6, %v4948_v13  ;;  %v2723_v10 = vpop.f32.mrb[33].mxu0  ;;  %v3815_v11 = vpop.f32.mrb[29].mxu1  ;;  %v2810_v46 = vadd.f32 %v4860_v26, %v2792_v7 }
 0xdc8   :  { %v2803_v14 = vadd.f32 %v2723_v10, %v4953_v24 }
 0xdc9   :  { %v3543_v20 = vmul.f32 -1.442695, %v2796_v31 }
 0xdca   :  { %v3544_v19 = vmul.f32 -1.442695, %v2803_v14 }
 0xdcb   :  { %4239 = vpow2.f32 %v3543_v20 }
 0xdd5   :  { %v4240_v15 = vpop.eup %4239 }
 0xdd6   :  { %v2800_v17 = vadd.f32 1.0, %v4240_v15 }
 0xdd8   :  { %4241 = vrcp.f32 %v2800_v17 }
 0xdd9   :  { %4243 = vpow2.f32 %v3544_v19 }
 0xde2   :  { %v4242_v4 = vpop.eup %4241 }
 0xde3   :  { %v2811_v21 = vmul.f32 %v4242_v4, %v2810_v46  ;;  %v4244_v30 = vpop.eup %4243 }
 0xde4   :  { %v2807_v32 = vadd.f32 1.0, %v4244_v30 }
 0xde5   :  { %v2812_v25 = vadd.f32 %v2811_v21, %v4840_v16 }
 0xde7   :  { %4245 = vtanh.f32 %v2812_v25 }
 0xde8   :  { %4247 = vrcp.f32 %v2807_v32 }
 0xdf1   :  { %v4246_v33 = vpop.eup %4245 }
 0xdf2   :  { %v2815_v54 = vrot.slane %v4246_v33, 2  ;;  %v4248_v40 = vpop.eup %4247 }
 0xdf4   :  { %v2817_v27 = vsub.f32 %v4930_v18, %v2815_v54 }
 0xdf6   :  { %v2819_v34 = vrot.slane %v2817_v27, 6 }
 0xdf8   :  { %v2821_v36 = vmul.f32 %v4248_v40, %v2819_v34 }
 0xdfa   :  { %v4959_v37 = vadd.f32 %v4246_v33, %v2821_v36  ;;  %v3365_v36 = vsel %vm1733_vm4, %v4866_v22, %v4888_v57  ;;  %v3372_v22 = vld [vmem:[%s5049_s9 + $0x8] sm:$0xff]  ;;  %v3373_v57 = vld [vmem:[%s5049_s9 + $0x10] sm:$0xff] }
 0xdfc   :  { %3545 = vmatmul.mubr.msk.f32.vlgmr.msra.gmra.mrb[34].mxu0 %vm305_vm3, %v4959_v37  ;;  %3825 = vmatmul.mubr.msk.f32.vlgmr.msra.gmra.mrb[30].mxu1 %vm305_vm3, %v4959_v37 }
 0xdfd   :  { %4075 = vmatpush1.bf16.msra.mxu0 %v4778_v1  ;;  %4082 = vmatpush3.bf16.msra.mxu1 %v4800_v49 }
 0xdfe   :  { %4077 = vmatprep.subr.bf16.mxu0 %v4783_v3  ;;  %4083 = vmatprep.subr.bf16.mxu1 %v4411_v23 }
 0xdff   :  { %3071 = vmatprep.mubr.f32.mxu0 %v4410_v0  ;;  %3835 = vmatprep.mubr.msk.f32.mxu1 %vm4412_vm2, %v4410_v0 }
 0xe01   :  { %4079 = vmatpush1.bf16.msra.mxu0 %v4785_v12  ;;  %4085 = vmatpush3.bf16.msra.mxu1 %v4809_v53 }
 0xe02   :  { %4087 = vmatprep.subr.bf16.mxu0 %v4776_v60  ;;  %4094 = vmatprep.subr.bf16.mxu1 %v4411_v23 }
 0xecf   :  { %v2892_v39 = vpop.f32.mrb[34].mxu0  ;;  %v2963_v42 = vpop.f32.mrb[30].mxu1 }
 0xed0   :  { %v2968_v41 = vrot.slane %v2892_v39, 6  ;;  %v2894_v44 = vpop.f32.mrb[35].mxu0  ;;  %v3826_v47 = vpop.f32.mrb[31].mxu1  ;;  %v2987_v60 = vadd.f32 %v4860_v26, %v2963_v42  ;;  %v3366_v39 = vsel %vm133_vm0, %v3365_v36, %v4909_v35 }
 0xed1   :  { %v2978_v43 = vrot.slane %v2894_v44, 6  ;;  %v3367_v42 = vsel %vm1736_vm5, %v3366_v39, %v4930_v18  ;;  %v3374_v44 = vld [vmem:[%s5049_s9 + $0x18] sm:$0xff] }
 0xed2   :  { %v2970_v8 = vadd.f32 %v2968_v41, %v4948_v13  ;;  %v2989_v52 = vrot.slane %v2987_v60, 6  ;;  %v3371_v41 = vld [vmem:[%s5049_s9] sm:$0xff]  ;;  %v4104_v18 = vpack.c.bf16 %v3374_v44, %v3373_v57 }
 0xed3   :  { %v2980_v55 = vadd.f32 %v2978_v43, %v4953_v24  ;;  %v4100_v35 = vpack.c.bf16 %v3372_v22, %v3371_v41 }
 0xed4   :  { %v3547_v48 = vmul.f32 -1.442695, %v2970_v8 }
 0xed5   :  { %v3548_v50 = vmul.f32 -1.442695, %v2980_v55 }
 0xed6   :  { %4249 = vpow2.f32 %v3547_v48 }
 0xee0   :  { %v4250_v38 = vpop.eup %4249 }
 0xee1   :  { %v2974_v51 = vadd.f32 1.0, %v4250_v38 }
 0xee3   :  { %4251 = vrcp.f32 %v2974_v51 }
 0xee4   :  { %4253 = vpow2.f32 %v3548_v50 }
 0xeed   :  { %v4252_v28 = vpop.eup %4251 }
 0xeee   :  { %v2991_v61 = vmul.f32 %v4252_v28, %v2989_v52  ;;  %v4254_v58 = vpop.eup %4253 }
 0xeef   :  { %v2984_v59 = vadd.f32 1.0, %v4254_v58 }
 0xef0   :  { %v2992_v45 = vadd.f32 %v2991_v61, %v4840_v16 }
 0xef2   :  { %4255 = vtanh.f32 %v2992_v45 }
 0xef3   :  { %4257 = vrcp.f32 %v2984_v59 }
 0xefc   :  { %v4256_v56 = vpop.eup %4255 }
 0xefd   :  { %v2995_v62 = vrot.slane %v4256_v56, 2  ;;  %v4258_v63 = vpop.eup %4257 }
 0xeff   :  { %v2997_v9 = vsub.f32 %v4959_v37, %v2995_v62 }
 0xf01   :  { %v2999_v29 = vrot.slane %v2997_v9, 6 }
 0xf03   :  { %v3001_v2 = vmul.f32 %v4258_v63, %v2999_v29 }
 0xf05   :  { %v4981_v5 = vadd.f32 %v4256_v56, %v3001_v2 }
 0xf07   :  { %v3004_v6 = vrot.slane %v4981_v5, 2 }
 0xf09   :  { %3549 = vmatmul.mubr.msk.f32.vlgmr.msra.gmra.mrb[36].mxu0 %vm305_vm3, %v3004_v6  ;;  %3836 = vmatmul.mubr.msk.f32.vlgmr.msra.gmra.mrb[32].mxu1 %vm305_vm3, %v3004_v6 }
 0xf0a   :  { %4089 = vmatpush1.bf16.msra.mxu0 %v4778_v1  ;;  %4096 = vmatpush3.bf16.msra.mxu1 %v4800_v49 }
 0xf0b   :  { %4091 = vmatprep.subr.bf16.mxu0 %v4783_v3  ;;  %4097 = vmatprep.subr.bf16.mxu1 %v4411_v23 }
 0xf0c   :  { %3252 = vmatprep.mubr.f32.mxu0 %v4410_v0  ;;  %3846 = vmatprep.mubr.msk.f32.mxu1 %vm4412_vm2, %v4410_v0 }
 0xf0e   :  { %4093 = vmatpush1.bf16.msra.mxu0 %v4785_v12  ;;  %4099 = vmatpush3.bf16.msra.mxu1 %v4809_v53 }
 0xf0f   :  { %4101 = vmatprep.subr.bf16.mxu0 %v4100_v35 }
 0xfdc   :  { %v3073_v7 = vpop.f32.mrb[36].mxu0  ;;  %v3144_v31 = vpop.f32.mrb[32].mxu1 }
 0xfdd   :  { %v3149_v10 = vrot.slane %v3073_v7, 4  ;;  %v3075_v11 = vpop.f32.mrb[37].mxu0  ;;  %v3837_v1 = vpop.f32.mrb[33].mxu1  ;;  %v3168_v12 = vadd.f32 %v4860_v26, %v3144_v31 }
 0xfde   :  { %v3159_v3 = vrot.slane %v3075_v11, 4 }
 0xfdf   :  { %v3151_v49 = vadd.f32 %v3149_v10, %v4948_v13  ;;  %v3170_v53 = vrot.slane %v3168_v12, 4 }
 0xfe0   :  { %v3161_v23 = vadd.f32 %v3159_v3, %v4953_v24 }
 0xfe1   :  { %v3551_v20 = vmul.f32 -1.442695, %v3151_v49 }
 0xfe2   :  { %v3552_v0 = vmul.f32 -1.442695, %v3161_v23 }
 0xfe3   :  { %4259 = vpow2.f32 %v3551_v20 }
 0xfed   :  { %v4260_v14 = vpop.eup %4259 }
 0xfee   :  { %v3155_v15 = vadd.f32 1.0, %v4260_v14 }
 0xff0   :  { %4261 = vrcp.f32 %v3155_v15 }
 0xff1   :  { %4263 = vpow2.f32 %v3552_v0 }
 0xffa   :  { %v4262_v17 = vpop.eup %4261 }
 0xffb   :  { %v3172_v19 = vmul.f32 %v4262_v17, %v3170_v53  ;;  %v4264_v4 = vpop.eup %4263 }
 0xffc   :  { %v3165_v21 = vadd.f32 1.0, %v4264_v4 }
 0xffd   :  { %v3173_v46 = vadd.f32 %v3172_v19, %v4840_v16 }
 0xfff   :  { %4265 = vtanh.f32 %v3173_v46 }
0x1000   :  { %4267 = vrcp.f32 %v3165_v21 }
0x1009   :  { %v4266_v25 = vpop.eup %4265 }
0x100a   :  { %v3176_v30 = vrot.slane %v4266_v25, 2  ;;  %v4268_v54 = vpop.eup %4267 }
0x100c   :  { %v3178_v32 = vsub.f32 %v4981_v5, %v3176_v30 }
0x100e   :  { %v3180_v33 = vrot.slane %v3178_v32, 6 }
0x1010   :  { %v3182_v27 = vmul.f32 %v4268_v54, %v3180_v33 }
0x1012   :  { %v3183_v34 = vadd.f32 %v4266_v25, %v3182_v27 }
0x1014   :  { %v3185_v40 = vrot.slane %v3183_v34, 4 }
0x1016   :  { %3553 = vmatmul.mubr.msk.f32.vlgmr.msra.gmra.mrb[38].mxu0 %vm305_vm3, %v3185_v40  ;;  %3847 = vmatmul.mubr.msk.f32.vlgmr.msra.gmra.mrb[34].mxu1 %vm305_vm3, %v3185_v40 }
0x1017   :  { %3857 = vmatprep.mubr.msk.f32.mxu0 %vm305_vm3, %v3367_v42  ;;  %4103 = vmatpush3.bf16.msra.mxu0 %v4100_v35 }
0x1018   :  { %4105 = vmatprep.subr.bf16.mxu0 %v4104_v18 }
0x101b   :  { %4107 = vmatpush3.bf16.msra.mxu0 %v4104_v18 }
0x10e9   :  { %v3254_v47 = vpop.f32.mrb[38].mxu0  ;;  %v3325_v8 = vpop.f32.mrb[34].mxu1 }
0x10ea   :  { %v3330_v48 = vrot.slane %v3254_v47, 2  ;;  %v3256_v43 = vpop.f32.mrb[39].mxu0  ;;  %v3848_v55 = vpop.f32.mrb[35].mxu1  ;;  %v3349_v45 = vadd.f32 %v4860_v26, %v3325_v8  ;;  %v3368_v26 = vsel %vm1733_vm4, %v4959_v37, %v4981_v5 }
0x10eb   :  { %v3340_v50 = vrot.slane %v3256_v43, 2  ;;  %v3369_v10 = vsel %vm133_vm0, %v3368_v26, %v3183_v34 }
0x10ec   :  { %v3332_v38 = vadd.f32 %v3330_v48, %v4948_v13  ;;  %v3351_v58 = vrot.slane %v3349_v45, 2 }
0x10ed   :  { %v3342_v60 = vadd.f32 %v3340_v50, %v4953_v24 }
0x10ee   :  { %v3555_v51 = vmul.f32 -1.442695, %v3332_v38 }
0x10ef   :  { %v3556_v61 = vmul.f32 -1.442695, %v3342_v60 }
0x10f0   :  { %4269 = vpow2.f32 %v3555_v51 }
0x10fa   :  { %v4270_v52 = vpop.eup %4269 }
0x10fb   :  { %v3336_v28 = vadd.f32 1.0, %v4270_v52 }
0x10fd   :  { %4271 = vrcp.f32 %v3336_v28 }
0x10fe   :  { %4273 = vpow2.f32 %v3556_v61 }
0x1107   :  { %v4272_v59 = vpop.eup %4271 }
0x1108   :  { %v3353_v56 = vmul.f32 %v4272_v59, %v3351_v58  ;;  %v4274_v9 = vpop.eup %4273 }
0x1109   :  { %v3346_v13 = vadd.f32 1.0, %v4274_v9 }
0x110a   :  { %v3354_v62 = vadd.f32 %v3353_v56, %v4840_v16  ;;  %v3557_v16 = vld [vmem:[#allocation9] ss:$0 sm:$0xff] }
0x110c   :  { %4275 = vtanh.f32 %v3354_v62 }
0x110d   :  { %4277 = vrcp.f32 %v3346_v13 }
0x1116   :  { %v4276_v29 = vpop.eup %4275 }
0x1117   :  { %v3357_v63 = vrot.slane %v4276_v29, 2  ;;  %v4278_v6 = vpop.eup %4277 }
0x1119   :  { %v3359_v2 = vsub.f32 %v3183_v34, %v3357_v63 }
0x111b   :  { %v3361_v24 = vrot.slane %v3359_v2, 6 }
0x111d   :  { %v3363_v7 = vmul.f32 %v4278_v6, %v3361_v24 }
0x111f   :  { %v3364_v31 = vadd.f32 %v4276_v29, %v3363_v7 }
0x1121   :  { %v3370_v11 = vsel %vm1736_vm5, %v3369_v10, %v3364_v31 }
0x1122   :  { %3858 = vmatmul.mubr.msk.f32.vlgmr.msra.gmra.mrb[40].mxu0 %vm305_vm3, %v3370_v11 }
0x11f5   :  { %v3859_v1 = vpop.f32.mrb[40].mxu0 }
0x11f6   :  { %v3460_v49 = vadd.f32 %v3859_v1, %v3557_v16  ;;  %v3454_v20 = vpop.f32.mrb[41].mxu0 }
0x11f7   :  { %v3455_v3 = vadd.f32 %v3557_v16, %v3454_v20 }
0x11f8   :  { %v3561_v23 = vmul.f32 -1.442695, %v3460_v49 }
0x11f9   :  { %v3560_v14 = vmul.f32 -1.442695, %v3455_v3 }
0x11fa   :  { %4279 = vpow2.f32 %v3561_v23 }
0x11fb   :  { %4281 = vpow2.f32 %v3560_v14 }
0x1204   :  { %v4280_v15 = vpop.eup %4279 }
0x1205   :  { %v4282_v0 = vpop.eup %4281  ;;  %v3470_v12 = vadd.f32 1.0, %v4280_v15 }
0x1206   :  { %v3469_v53 = vadd.f32 1.0, %v4282_v0 }
0x1207   :  { %4283 = vrcp.f32 %v3470_v12 }
0x1208   :  { %4285 = vrcp.f32 %v3469_v53 }
0x1211   :  { %v4284_v37 = vpop.eup %4283 }
0x1212   :  { %v4286_v5 = vpop.eup %4285  ;;  %3476 = vst.msk [vmem:[%s5051_s11 + $0x8] sm:$0xff] %vm305_vm3, %v4284_v37 }
0x1213   :  { %3475 = vst.msk [vmem:[%s5051_s11] sm:$0xff] %vm305_vm3, %v4286_v5 }
0x1214   :  { %3481 = vsyncpa [#allocation3], 1 }
0x1215   :  { %3482 = vsyncpa [#allocation5], 1 }
0x1216   :  { %3483 = vsyncpa [#allocation8], 1 }

</bundles_post_ra>
